<compile_context>
chip_gen: v7x
topology: tpu7x:2x2x1
jax: 0.10.0
libtpu: 0.0.40
codegen_flags: <defaults>
</compile_context>

<pallas_src>
import functools

import numpy as np

import jax
import jax.numpy as jnp
from jax.experimental import pallas as pl
from jax.experimental.pallas import tpu as pltpu


# ----------------------------------------------------------------------------
# Fused kernel: one batch tile per grid step.
# ----------------------------------------------------------------------------
def _lenet_fused_kernel(x_ref, t1_ref, b1c_ref, t2_ref, b2c_ref,
                        w1_ref, b1f_ref, w2_ref, b2f_ref, o_ref,
                        *, pair_conv2_taps):
    f32, bf16 = jnp.float32, jnp.bfloat16
    b = x_ref.shape[1]                                   # batch tile (multiple of 16)

    # ---- conv1 (5x5 valid) + 2x2 maxpool + relu -----------------------------
    # x_ref: (28, B, 28) bf16 = (image row, batch, image col).  For tap di the
    # LHS is the contiguous row slice [di, di+24) reshaped to (24B, 28): output
    # rows 0..23 for BOTH parities in one matmul.  T1[di] is banded over the
    # input columns with output lanes ordered (col_parity, ch, pooled_col).
    y1 = None
    for di in range(5):                                  # vertical kernel tap
        lhs = x_ref[di:di + 24].reshape(24 * b, 28)      # zero-copy slice+merge
        part = jnp.dot(lhs, t1_ref[di], preferred_element_type=f32)
        y1 = part if y1 is None else y1 + part           # (24B, 256) f32
    z1 = jnp.maximum(y1[:, :128], y1[:, 128:])           # pool over column pairs
    z1 = z1.reshape(12, 2, b, 128)                       # free split: (row, parity)
    z1 = jnp.maximum(z1[:, 0], z1[:, 1])                 # pool over row pairs
    act1 = jnp.maximum(z1.reshape(12 * b, 128) + b1c_ref[...], 0.0)
    # act1: (12B, 128) f32, rows=(pooled_row, b), lanes = c1*12 + pooled_col.

    # ---- conv2 (5x5 valid) + 2x2 maxpool + relu -----------------------------
    # TODO(synk): nn.Dropout2d (conv2_drop) is identity in eval mode; train-mode
    # channel dropout is not implemented here.
    a1 = act1.astype(bf16).reshape(12, b, 128)           # free split
    if pair_conv2_taps:
        # Pair taps into K=256 to fill the 256-deep MXU (v6e / v7x).
        y2 = None
        for d0 in (0, 2):
            lhs = jnp.concatenate(
                [a1[d0:d0 + 8].reshape(8 * b, 128),
                 a1[d0 + 1:d0 + 9].reshape(8 * b, 128)], axis=-1)  # (8B, 256)
            part = jnp.dot(lhs, t2_ref[d0 * 128:(d0 + 2) * 128],
                           preferred_element_type=f32)
            y2 = part if y2 is None else y2 + part       # (8B, 256) f32
        y2 = y2 + jnp.dot(a1[4:12].reshape(8 * b, 128), t2_ref[512:640],
                          preferred_element_type=f32)
    else:
        # v5e (128-deep MXU): per-tap K=128 dots, LHS slices are zero-copy.
        y2 = None
        for di in range(5):
            part = jnp.dot(a1[di:di + 8].reshape(8 * b, 128),
                           t2_ref[di * 128:(di + 1) * 128],
                           preferred_element_type=f32)
            y2 = part if y2 is None else y2 + part       # (8B, 256) f32
    z2 = jnp.maximum(y2[:, :128], y2[:, 128:])           # pool over column pairs
    z2 = z2.reshape(4, 2, b, 128)
    act2 = jnp.concatenate(                              # pool over row pairs ->
        [jnp.maximum(z2[u, 0], z2[u, 1]) for u in range(4)], axis=-1)
    act2 = jnp.maximum(act2 + b2c_ref[...], 0.0)         # (B, 512), 320 live lanes

    # ---- fc1 -> relu -> dropout(identity) -> fc2 -> relu -> log_softmax -----
    h = jnp.dot(act2.astype(bf16), w1_ref[...], preferred_element_type=f32)
    h = jnp.maximum(h + b1f_ref[...], 0.0)               # (B, 128); pad lanes = 0
    # TODO(synk): F.dropout(x, training=self.training) is identity at inference.
    y = jnp.dot(h.astype(bf16), w2_ref[...], preferred_element_type=f32)
    y = jnp.maximum(y + b2f_ref[...], 0.0)               # relu(fc2) as in the module
    # Lane-dense output: mask the 118 pad-class lanes before the softmax stats.
    valid = jax.lax.broadcasted_iota(jnp.int32, y.shape, 1) < 10
    ym = jnp.where(valid, y, -1e30)
    m = jnp.max(ym, axis=-1, keepdims=True)
    lse = m + jnp.log(jnp.sum(jnp.exp(ym - m), axis=-1, keepdims=True))
    o_ref[...] = ym - lse                                # (B, 128), cols 0..9 valid


# ----------------------------------------------------------------------------
# Host-side weight preprocessing (PyTorch layout -> banded bf16 MXU matrices).
# ----------------------------------------------------------------------------
def _prepare_params(p):
    f32, bf16 = jnp.float32, jnp.bfloat16
    w1 = p["conv1_w"].astype(f32)[:, 0]                  # (10, 5, 5)
    w2 = p["conv2_w"].astype(f32)                        # (20, 10, 5, 5)

    # conv1 banded matrices: T1[di][2v+jp+dj, jp*128 + o*12 + v] = w1[o, di, dj]
    di, dj, jp, o, v = np.indices((5, 5, 2, 10, 12))
    t1 = jnp.zeros((5, 28, 256), f32).at[
        di, 2 * v + jp + dj, jp * 128 + o * 12 + v].set(w1[o, di, dj])
    b1c = jnp.zeros((1, 128), f32).at[0, :120].set(
        jnp.repeat(p["conv1_b"].astype(f32), 12))

    # conv2 banded matrices:
    # T2[di][c1*12 + 2*v2+jp+dj, jp*128 + o2*4 + v2] = w2[o2, c1, di, dj]
    di, dj, jp, o2, v2, c1 = np.indices((5, 5, 2, 20, 4, 10))
    t2 = jnp.zeros((5, 128, 256), f32).at[
        di, c1 * 12 + 2 * v2 + jp + dj, jp * 128 + o2 * 4 + v2].set(
            w2[o2, c1, di, dj])

    # conv2 bias / fc1 weights laid out for the kernel's (u2, o2, v2) flatten
    # order (512 lanes, 320 live); fc widths zero-padded 50 -> 128, 10 -> 128.
    u2, o2, v2 = np.indices((4, 20, 4))
    rows512 = (u2 * 128 + o2 * 4 + v2).ravel()
    f_torch = (o2 * 16 + u2 * 4 + v2).ravel()            # torch .view(-1, 320) order
    b2c = jnp.zeros((1, 512), f32).at[0, rows512].set(
        p["conv2_b"].astype(f32)[o2.ravel()])
    w1fc = jnp.zeros((512, 50), f32).at[rows512].set(p["fc1_w"].astype(f32).T[f_torch])
    w1fc = jnp.pad(w1fc, ((0, 0), (0, 78)))              # (512, 128)
    b1fc = jnp.pad(p["fc1_b"].astype(f32), (0, 78))[None]          # (1, 128)
    w2fc = jnp.pad(p["fc2_w"].astype(f32).T, ((0, 78), (0, 118)))  # (128, 128)
    b2fc = jnp.pad(p["fc2_b"].astype(f32), (0, 118))[None]         # (1, 128)

    return dict(t1=t1.astype(bf16), b1c=b1c,
                t2=t2.reshape(640, 256).astype(bf16), b2c=b2c,
                w1=w1fc.astype(bf16), b1f=b1fc,
                w2=w2fc.astype(bf16), b2f=b2fc)


def _round_up(a, m):
    return (a + m - 1) // m * m


def _pick_btile(n, batch_tile):
    """Batch tile: multiple of 16, and >= 2 grid steps whenever batch allows
    (so the 'parallel' axis can shard across v7x's two TensorCores)."""
    n16 = _round_up(max(n, 1), 16)
    bt = min(batch_tile, n16)
    if bt == n16 and n16 > 16:
        bt = _round_up(n16 // 2, 16)
    return bt


def _chip_tuning():
    """Per-generation defaults (safe fallbacks if the query fails)."""
    try:
        kind = jax.devices()[0].device_kind.lower()
    except Exception:
        kind = ""
    is_v5 = "v5" in kind
    big_vmem = is_v5 or ("v6" in kind)                   # 128 MiB physical VMEM
    batch_tile = 512 if big_vmem else 256                # v7x: 64 MiB -> smaller tile
    vmem_limit = (96 if big_vmem else 48) * 1024 * 1024
    pair_conv2 = not is_v5                               # K=256 fills 256-deep MXUs
    return batch_tile, vmem_limit, pair_conv2


# ----------------------------------------------------------------------------
# Forward pass factory: weight prep once (host), per-batch jitted pallas_call.
# ----------------------------------------------------------------------------
def make_lenet_forward(params, *, batch_tile=None, vmem_limit_bytes=None):
    bt_default, vmem_default, pair_conv2 = _chip_tuning()
    batch_tile = batch_tile or bt_default
    vmem_limit_bytes = vmem_limit_bytes or vmem_default
    kp = _prepare_params(params)                         # concrete, done once
    kernel = functools.partial(_lenet_fused_kernel, pair_conv2_taps=pair_conv2)

    @jax.jit
    def forward(x):
        """x: (N, 1, 28, 28) float32 -> (N, 10) float32 log-probs."""
        n = x.shape[0]
        btile = _pick_btile(n, batch_tile)
        n_pad = _round_up(n, btile)

        # TODO(synk): for throughput inference, produce x upstream directly as a
        # (28, N, 28) bf16 (row, batch, col) slab; this pad+transpose is an
        # extra HBM pass over the (tiny) input in front of the kernel.
        x3 = x.reshape(n, 28, 28)
        x3 = jnp.pad(x3, ((0, n_pad - n), (0, 0), (0, 0)))
        x_t = jnp.transpose(x3, (1, 0, 2)).astype(jnp.bfloat16)   # (28, n_pad, 28)

        out = pl.pallas_call(
            kernel,
            out_shape=jax.ShapeDtypeStruct((n_pad, 128), jnp.float32),
            grid_spec=pltpu.PrefetchScalarGridSpec(
                num_scalar_prefetch=0,
                grid=(n_pad // btile,),
                in_specs=[
                    pl.BlockSpec((28, btile, 28), lambda i: (0, i, 0)),  # input slab
                    pl.BlockSpec((5, 28, 256), lambda i: (0, 0, 0)),     # conv1 T
                    pl.BlockSpec((1, 128), lambda i: (0, 0)),            # conv1 bias
                    pl.BlockSpec((640, 256), lambda i: (0, 0)),          # conv2 T (5x128 rows)
                    pl.BlockSpec((1, 512), lambda i: (0, 0)),            # conv2 bias
                    pl.BlockSpec((512, 128), lambda i: (0, 0)),          # fc1 W
                    pl.BlockSpec((1, 128), lambda i: (0, 0)),            # fc1 b
                    pl.BlockSpec((128, 128), lambda i: (0, 0)),          # fc2 W (padded)
                    pl.BlockSpec((1, 128), lambda i: (0, 0)),            # fc2 b (padded)
                ],
                out_specs=pl.BlockSpec((btile, 128), lambda i: (i, 0)),
            ),
            compiler_params=pltpu.CompilerParams(
                dimension_semantics=("parallel",),
                vmem_limit_bytes=vmem_limit_bytes,
            ),
        )(x_t, kp["t1"], kp["b1c"], kp["t2"], kp["b2c"],
          kp["w1"], kp["b1f"], kp["w2"], kp["b2f"])
        return out[:n, :10]

    return forward


# ----------------------------------------------------------------------------
# Pure-JAX reference (PyTorch semantics, f32) + param init for the self-test.
# ----------------------------------------------------------------------------
def lenet_reference(x, p):
    dn = ("NCHW", "OIHW", "NCHW")
    y = jax.lax.conv_general_dilated(x, p["conv1_w"], (1, 1), "VALID",
                                     dimension_numbers=dn)
    y = y + p["conv1_b"][None, :, None, None]
    y = jax.lax.reduce_window(y, -jnp.inf, jax.lax.max,
                              (1, 1, 2, 2), (1, 1, 2, 2), "VALID")
    y = jnp.maximum(y, 0.0)
    y = jax.lax.conv_general_dilated(y, p["conv2_w"], (1, 1), "VALID",
                                     dimension_numbers=dn)
    y = y + p["conv2_b"][None, :, None, None]
    y = jax.lax.reduce_window(y, -jnp.inf, jax.lax.max,
                              (1, 1, 2, 2), (1, 1, 2, 2), "VALID")
    y = jnp.maximum(y, 0.0)
    y = y.reshape(y.shape[0], 320)
    y = jnp.maximum(y @ p["fc1_w"].T + p["fc1_b"], 0.0)
    y = jnp.maximum(y @ p["fc2_w"].T + p["fc2_b"], 0.0)
    return jax.nn.log_softmax(y, axis=-1)


def init_params(key):
    ks = jax.random.split(key, 8)

    def u(k, shape, fan_in):
        bound = 1.0 / np.sqrt(float(fan_in))
        return jax.random.uniform(k, shape, jnp.float32, -bound, bound)

    return {
        "conv1_w": u(ks[0], (10, 1, 5, 5), 25), "conv1_b": u(ks[1], (10,), 25),
        "conv2_w": u(ks[2], (20, 10, 5, 5), 250), "conv2_b": u(ks[3], (20,), 250),
        "fc1_w": u(ks[4], (50, 320), 320), "fc1_b": u(ks[5], (50,), 320),
        "fc2_w": u(ks[6], (10, 50), 50), "fc2_b": u(ks[7], (10,), 50),
    }


if __name__ == "__main__":
    key = jax.random.PRNGKey(0)
    pkey, xkey = jax.random.split(key)
    params = init_params(pkey)
    x = jax.random.normal(xkey, (2, 1, 28, 28), jnp.float32)  # 28x28 implied by 320=20*4*4

    forward = make_lenet_forward(params)
    out = jax.block_until_ready(forward(x))
    assert out.shape == (2, 10) and out.dtype == jnp.float32

    ref = lenet_reference(x, params)
    err = float(jnp.max(jnp.abs(out - ref)))
    assert err < 5e-2, f"kernel/reference mismatch, max abs err = {err}"

    print("KERNEL_OK")
</pallas_src>

<mosaic_0001>
module attributes {stable_mosaic.version = 11 : i64} {
  func.func @_lenet_fused_kernel(%arg0: i32, %arg1: memref<28x16x28xbf16, #tpu.memory_space<vmem>>, %arg2: memref<5x28x256xbf16, #tpu.memory_space<vmem>>, %arg3: memref<1x128xf32, #tpu.memory_space<vmem>>, %arg4: memref<640x256xbf16, #tpu.memory_space<vmem>>, %arg5: memref<1x512xf32, #tpu.memory_space<vmem>>, %arg6: memref<512x128xbf16, #tpu.memory_space<vmem>>, %arg7: memref<1x128xf32, #tpu.memory_space<vmem>>, %arg8: memref<128x128xbf16, #tpu.memory_space<vmem>>, %arg9: memref<1x128xf32, #tpu.memory_space<vmem>>, %arg10: memref<16x128xf32, #tpu.memory_space<vmem>>) attributes {dimension_semantics = [#tpu.dimension_semantics<parallel>], iteration_bounds = array<i64: 1>, scalar_prefetch = 0 : i64, scratch_operands = 0 : i64, tpu.core_type = #tpu.core_type<tc>, window_params = [{transform_indices = @transform_0, window_bounds = array<i64: 28, 16, 28>}, {pipeline_mode = #tpu.pipeline_mode<synchronous>, transform_indices = @transform_1, window_bounds = array<i64: 5, 28, 256>}, {pipeline_mode = #tpu.pipeline_mode<synchronous>, transform_indices = @transform_2, window_bounds = array<i64: 1, 128>}, {pipeline_mode = #tpu.pipeline_mode<synchronous>, transform_indices = @transform_3, window_bounds = array<i64: 640, 256>}, {pipeline_mode = #tpu.pipeline_mode<synchronous>, transform_indices = @transform_4, window_bounds = array<i64: 1, 512>}, {pipeline_mode = #tpu.pipeline_mode<synchronous>, transform_indices = @transform_5, window_bounds = array<i64: 512, 128>}, {pipeline_mode = #tpu.pipeline_mode<synchronous>, transform_indices = @transform_6, window_bounds = array<i64: 1, 128>}, {pipeline_mode = #tpu.pipeline_mode<synchronous>, transform_indices = @transform_7, window_bounds = array<i64: 128, 128>}, {pipeline_mode = #tpu.pipeline_mode<synchronous>, transform_indices = @transform_8, window_bounds = array<i64: 1, 128>}, {transform_indices = @transform_9, window_bounds = array<i64: 16, 128>}]} {
    %c0 = arith.constant 0 : index
    %c0_0 = arith.constant 0 : index
    %c0_1 = arith.constant 0 : index
    %0 = vector.load %arg1[%c0, %c0_0, %c0_1] : memref<28x16x28xbf16, #tpu.memory_space<vmem>>, vector<24x16x28xbf16>
    %1 = vector.shape_cast %0 : vector<24x16x28xbf16> to vector<384x28xbf16>
    %c0_2 = arith.constant 0 : index
    %c0_3 = arith.constant 0 : index
    %c0_4 = arith.constant 0 : index
    %2 = vector.load %arg2[%c0_2, %c0_3, %c0_4] : memref<5x28x256xbf16, #tpu.memory_space<vmem>>, vector<1x28x256xbf16>
    %3 = vector.shape_cast %2 : vector<1x28x256xbf16> to vector<28x256xbf16>
    %cst = arith.constant dense<0.000000e+00> : vector<384x256xf32>
    %4 = tpu.matmul %1, %3, %cst {dimension_numbers = #tpu.dot_dimension_numbers<[1], [0], [0], [1], [0, 0, 1, 1], [], []>} : vector<384x28xbf16>, vector<28x256xbf16>, vector<384x256xf32> -> vector<384x256xf32>
    %c1 = arith.constant 1 : index
    %c0_5 = arith.constant 0 : index
    %c0_6 = arith.constant 0 : index
    %5 = vector.load %arg1[%c1, %c0_5, %c0_6] : memref<28x16x28xbf16, #tpu.memory_space<vmem>>, vector<24x16x28xbf16>
    %6 = vector.shape_cast %5 : vector<24x16x28xbf16> to vector<384x28xbf16>
    %c1_7 = arith.constant 1 : index
    %c0_8 = arith.constant 0 : index
    %c0_9 = arith.constant 0 : index
    %7 = vector.load %arg2[%c1_7, %c0_8, %c0_9] : memref<5x28x256xbf16, #tpu.memory_space<vmem>>, vector<1x28x256xbf16>
    %8 = vector.shape_cast %7 : vector<1x28x256xbf16> to vector<28x256xbf16>
    %cst_10 = arith.constant dense<0.000000e+00> : vector<384x256xf32>
    %9 = tpu.matmul %6, %8, %cst_10 {dimension_numbers = #tpu.dot_dimension_numbers<[1], [0], [0], [1], [0, 0, 1, 1], [], []>} : vector<384x28xbf16>, vector<28x256xbf16>, vector<384x256xf32> -> vector<384x256xf32>
    %10 = arith.addf %4, %9 : vector<384x256xf32>
    %c2 = arith.constant 2 : index
    %c0_11 = arith.constant 0 : index
    %c0_12 = arith.constant 0 : index
    %11 = vector.load %arg1[%c2, %c0_11, %c0_12] : memref<28x16x28xbf16, #tpu.memory_space<vmem>>, vector<24x16x28xbf16>
    %12 = vector.shape_cast %11 : vector<24x16x28xbf16> to vector<384x28xbf16>
    %c2_13 = arith.constant 2 : index
    %c0_14 = arith.constant 0 : index
    %c0_15 = arith.constant 0 : index
    %13 = vector.load %arg2[%c2_13, %c0_14, %c0_15] : memref<5x28x256xbf16, #tpu.memory_space<vmem>>, vector<1x28x256xbf16>
    %14 = vector.shape_cast %13 : vector<1x28x256xbf16> to vector<28x256xbf16>
    %cst_16 = arith.constant dense<0.000000e+00> : vector<384x256xf32>
    %15 = tpu.matmul %12, %14, %cst_16 {dimension_numbers = #tpu.dot_dimension_numbers<[1], [0], [0], [1], [0, 0, 1, 1], [], []>} : vector<384x28xbf16>, vector<28x256xbf16>, vector<384x256xf32> -> vector<384x256xf32>
    %16 = arith.addf %10, %15 : vector<384x256xf32>
    %c3 = arith.constant 3 : index
    %c0_17 = arith.constant 0 : index
    %c0_18 = arith.constant 0 : index
    %17 = vector.load %arg1[%c3, %c0_17, %c0_18] : memref<28x16x28xbf16, #tpu.memory_space<vmem>>, vector<24x16x28xbf16>
    %18 = vector.shape_cast %17 : vector<24x16x28xbf16> to vector<384x28xbf16>
    %c3_19 = arith.constant 3 : index
    %c0_20 = arith.constant 0 : index
    %c0_21 = arith.constant 0 : index
    %19 = vector.load %arg2[%c3_19, %c0_20, %c0_21] : memref<5x28x256xbf16, #tpu.memory_space<vmem>>, vector<1x28x256xbf16>
    %20 = vector.shape_cast %19 : vector<1x28x256xbf16> to vector<28x256xbf16>
    %cst_22 = arith.constant dense<0.000000e+00> : vector<384x256xf32>
    %21 = tpu.matmul %18, %20, %cst_22 {dimension_numbers = #tpu.dot_dimension_numbers<[1], [0], [0], [1], [0, 0, 1, 1], [], []>} : vector<384x28xbf16>, vector<28x256xbf16>, vector<384x256xf32> -> vector<384x256xf32>
    %22 = arith.addf %16, %21 : vector<384x256xf32>
    %c4 = arith.constant 4 : index
    %c0_23 = arith.constant 0 : index
    %c0_24 = arith.constant 0 : index
    %23 = vector.load %arg1[%c4, %c0_23, %c0_24] : memref<28x16x28xbf16, #tpu.memory_space<vmem>>, vector<24x16x28xbf16>
    %24 = vector.shape_cast %23 : vector<24x16x28xbf16> to vector<384x28xbf16>
    %c4_25 = arith.constant 4 : index
    %c0_26 = arith.constant 0 : index
    %c0_27 = arith.constant 0 : index
    %25 = vector.load %arg2[%c4_25, %c0_26, %c0_27] : memref<5x28x256xbf16, #tpu.memory_space<vmem>>, vector<1x28x256xbf16>
    %26 = vector.shape_cast %25 : vector<1x28x256xbf16> to vector<28x256xbf16>
    %cst_28 = arith.constant dense<0.000000e+00> : vector<384x256xf32>
    %27 = tpu.matmul %24, %26, %cst_28 {dimension_numbers = #tpu.dot_dimension_numbers<[1], [0], [0], [1], [0, 0, 1, 1], [], []>} : vector<384x28xbf16>, vector<28x256xbf16>, vector<384x256xf32> -> vector<384x256xf32>
    %28 = arith.addf %22, %27 : vector<384x256xf32>
    %29 = vector.extract_strided_slice %28 {offsets = [0, 0], sizes = [384, 128], strides = [1, 1]} : vector<384x256xf32> to vector<384x128xf32>
    %30 = vector.extract_strided_slice %28 {offsets = [0, 128], sizes = [384, 128], strides = [1, 1]} : vector<384x256xf32> to vector<384x128xf32>
    %31 = arith.maximumf %29, %30 : vector<384x128xf32>
    %32 = vector.shape_cast %31 : vector<384x128xf32> to vector<12x2x16x128xf32>
    %33 = vector.extract_strided_slice %32 {offsets = [0, 0, 0, 0], sizes = [12, 1, 16, 128], strides = [1, 1, 1, 1]} : vector<12x2x16x128xf32> to vector<12x1x16x128xf32>
    %34 = vector.shape_cast %33 : vector<12x1x16x128xf32> to vector<12x16x128xf32>
    %35 = vector.extract_strided_slice %32 {offsets = [0, 1, 0, 0], sizes = [12, 1, 16, 128], strides = [1, 1, 1, 1]} : vector<12x2x16x128xf32> to vector<12x1x16x128xf32>
    %36 = vector.shape_cast %35 : vector<12x1x16x128xf32> to vector<12x16x128xf32>
    %37 = arith.maximumf %34, %36 : vector<12x16x128xf32>
    %38 = vector.shape_cast %37 : vector<12x16x128xf32> to vector<192x128xf32>
    %c0_29 = arith.constant 0 : index
    %c0_30 = arith.constant 0 : index
    %39 = vector.load %arg3[%c0_29, %c0_30] : memref<1x128xf32, #tpu.memory_space<vmem>>, vector<1x128xf32>
    %40 = vector.broadcast %39 : vector<1x128xf32> to vector<192x128xf32>
    %41 = arith.addf %38, %40 : vector<192x128xf32>
    %cst_31 = arith.constant 0.000000e+00 : f32
    %42 = vector.broadcast %cst_31 : f32 to vector<192x128xf32>
    %43 = arith.maximumf %41, %42 : vector<192x128xf32>
    %44 = arith.truncf %43 : vector<192x128xf32> to vector<192x128xbf16>
    %45 = vector.shape_cast %44 : vector<192x128xbf16> to vector<12x16x128xbf16>
    %46 = vector.extract_strided_slice %45 {offsets = [0, 0, 0], sizes = [8, 16, 128], strides = [1, 1, 1]} : vector<12x16x128xbf16> to vector<8x16x128xbf16>
    %47 = vector.shape_cast %46 : vector<8x16x128xbf16> to vector<128x128xbf16>
    %48 = vector.extract_strided_slice %45 {offsets = [1, 0, 0], sizes = [8, 16, 128], strides = [1, 1, 1]} : vector<12x16x128xbf16> to vector<8x16x128xbf16>
    %49 = vector.shape_cast %48 : vector<8x16x128xbf16> to vector<128x128xbf16>
    %50 = tpu.concatenate %47, %49 in 1 : vector<128x128xbf16>, vector<128x128xbf16> -> vector<128x256xbf16>
    %c0_32 = arith.constant 0 : index
    %c0_33 = arith.constant 0 : index
    %51 = vector.load %arg4[%c0_32, %c0_33] : memref<640x256xbf16, #tpu.memory_space<vmem>>, vector<256x256xbf16>
    %cst_34 = arith.constant dense<0.000000e+00> : vector<128x256xf32>
    %52 = tpu.matmul %50, %51, %cst_34 {dimension_numbers = #tpu.dot_dimension_numbers<[1], [0], [0], [1], [0, 0, 1, 1], [], []>} : vector<128x256xbf16>, vector<256x256xbf16>, vector<128x256xf32> -> vector<128x256xf32>
    %53 = vector.extract_strided_slice %45 {offsets = [2, 0, 0], sizes = [8, 16, 128], strides = [1, 1, 1]} : vector<12x16x128xbf16> to vector<8x16x128xbf16>
    %54 = vector.shape_cast %53 : vector<8x16x128xbf16> to vector<128x128xbf16>
    %55 = vector.extract_strided_slice %45 {offsets = [3, 0, 0], sizes = [8, 16, 128], strides = [1, 1, 1]} : vector<12x16x128xbf16> to vector<8x16x128xbf16>
    %56 = vector.shape_cast %55 : vector<8x16x128xbf16> to vector<128x128xbf16>
    %57 = tpu.concatenate %54, %56 in 1 : vector<128x128xbf16>, vector<128x128xbf16> -> vector<128x256xbf16>
    %c256 = arith.constant 256 : index
    %c0_35 = arith.constant 0 : index
    %58 = vector.load %arg4[%c256, %c0_35] : memref<640x256xbf16, #tpu.memory_space<vmem>>, vector<256x256xbf16>
    %cst_36 = arith.constant dense<0.000000e+00> : vector<128x256xf32>
    %59 = tpu.matmul %57, %58, %cst_36 {dimension_numbers = #tpu.dot_dimension_numbers<[1], [0], [0], [1], [0, 0, 1, 1], [], []>} : vector<128x256xbf16>, vector<256x256xbf16>, vector<128x256xf32> -> vector<128x256xf32>
    %60 = arith.addf %52, %59 : vector<128x256xf32>
    %61 = vector.extract_strided_slice %45 {offsets = [4, 0, 0], sizes = [8, 16, 128], strides = [1, 1, 1]} : vector<12x16x128xbf16> to vector<8x16x128xbf16>
    %62 = vector.shape_cast %61 : vector<8x16x128xbf16> to vector<128x128xbf16>
    %c512 = arith.constant 512 : index
    %c0_37 = arith.constant 0 : index
    %63 = vector.load %arg4[%c512, %c0_37] : memref<640x256xbf16, #tpu.memory_space<vmem>>, vector<128x256xbf16>
    %cst_38 = arith.constant dense<0.000000e+00> : vector<128x256xf32>
    %64 = tpu.matmul %62, %63, %cst_38 {dimension_numbers = #tpu.dot_dimension_numbers<[1], [0], [0], [1], [0, 0, 1, 1], [], []>} : vector<128x128xbf16>, vector<128x256xbf16>, vector<128x256xf32> -> vector<128x256xf32>
    %65 = arith.addf %60, %64 : vector<128x256xf32>
    %66 = vector.extract_strided_slice %65 {offsets = [0, 0], sizes = [128, 128], strides = [1, 1]} : vector<128x256xf32> to vector<128x128xf32>
    %67 = vector.extract_strided_slice %65 {offsets = [0, 128], sizes = [128, 128], strides = [1, 1]} : vector<128x256xf32> to vector<128x128xf32>
    %68 = arith.maximumf %66, %67 : vector<128x128xf32>
    %69 = vector.shape_cast %68 : vector<128x128xf32> to vector<4x2x16x128xf32>
    %70 = vector.extract_strided_slice %69 {offsets = [0, 0, 0, 0], sizes = [1, 1, 16, 128], strides = [1, 1, 1, 1]} : vector<4x2x16x128xf32> to vector<1x1x16x128xf32>
    %71 = vector.shape_cast %70 : vector<1x1x16x128xf32> to vector<16x128xf32>
    %72 = vector.extract_strided_slice %69 {offsets = [0, 1, 0, 0], sizes = [1, 1, 16, 128], strides = [1, 1, 1, 1]} : vector<4x2x16x128xf32> to vector<1x1x16x128xf32>
    %73 = vector.shape_cast %72 : vector<1x1x16x128xf32> to vector<16x128xf32>
    %74 = arith.maximumf %71, %73 : vector<16x128xf32>
    %75 = vector.extract_strided_slice %69 {offsets = [1, 0, 0, 0], sizes = [1, 1, 16, 128], strides = [1, 1, 1, 1]} : vector<4x2x16x128xf32> to vector<1x1x16x128xf32>
    %76 = vector.shape_cast %75 : vector<1x1x16x128xf32> to vector<16x128xf32>
    %77 = vector.extract_strided_slice %69 {offsets = [1, 1, 0, 0], sizes = [1, 1, 16, 128], strides = [1, 1, 1, 1]} : vector<4x2x16x128xf32> to vector<1x1x16x128xf32>
    %78 = vector.shape_cast %77 : vector<1x1x16x128xf32> to vector<16x128xf32>
    %79 = arith.maximumf %76, %78 : vector<16x128xf32>
    %80 = vector.extract_strided_slice %69 {offsets = [2, 0, 0, 0], sizes = [1, 1, 16, 128], strides = [1, 1, 1, 1]} : vector<4x2x16x128xf32> to vector<1x1x16x128xf32>
    %81 = vector.shape_cast %80 : vector<1x1x16x128xf32> to vector<16x128xf32>
    %82 = vector.extract_strided_slice %69 {offsets = [2, 1, 0, 0], sizes = [1, 1, 16, 128], strides = [1, 1, 1, 1]} : vector<4x2x16x128xf32> to vector<1x1x16x128xf32>
    %83 = vector.shape_cast %82 : vector<1x1x16x128xf32> to vector<16x128xf32>
    %84 = arith.maximumf %81, %83 : vector<16x128xf32>
    %85 = vector.extract_strided_slice %69 {offsets = [3, 0, 0, 0], sizes = [1, 1, 16, 128], strides = [1, 1, 1, 1]} : vector<4x2x16x128xf32> to vector<1x1x16x128xf32>
    %86 = vector.shape_cast %85 : vector<1x1x16x128xf32> to vector<16x128xf32>
    %87 = vector.extract_strided_slice %69 {offsets = [3, 1, 0, 0], sizes = [1, 1, 16, 128], strides = [1, 1, 1, 1]} : vector<4x2x16x128xf32> to vector<1x1x16x128xf32>
    %88 = vector.shape_cast %87 : vector<1x1x16x128xf32> to vector<16x128xf32>
    %89 = arith.maximumf %86, %88 : vector<16x128xf32>
    %90 = tpu.concatenate %74, %79, %84, %89 in 1 : vector<16x128xf32>, vector<16x128xf32>, vector<16x128xf32>, vector<16x128xf32> -> vector<16x512xf32>
    %c0_39 = arith.constant 0 : index
    %c0_40 = arith.constant 0 : index
    %91 = vector.load %arg5[%c0_39, %c0_40] : memref<1x512xf32, #tpu.memory_space<vmem>>, vector<1x512xf32>
    %92 = vector.broadcast %91 : vector<1x512xf32> to vector<16x512xf32>
    %93 = arith.addf %90, %92 : vector<16x512xf32>
    %cst_41 = arith.constant 0.000000e+00 : f32
    %94 = vector.broadcast %cst_41 : f32 to vector<16x512xf32>
    %95 = arith.maximumf %93, %94 : vector<16x512xf32>
    %96 = arith.truncf %95 : vector<16x512xf32> to vector<16x512xbf16>
    %c0_42 = arith.constant 0 : index
    %c0_43 = arith.constant 0 : index
    %97 = vector.load %arg6[%c0_42, %c0_43] : memref<512x128xbf16, #tpu.memory_space<vmem>>, vector<512x128xbf16>
    %cst_44 = arith.constant dense<0.000000e+00> : vector<16x128xf32>
    %98 = tpu.matmul %96, %97, %cst_44 {dimension_numbers = #tpu.dot_dimension_numbers<[1], [0], [0], [1], [0, 0, 1, 1], [], []>} : vector<16x512xbf16>, vector<512x128xbf16>, vector<16x128xf32> -> vector<16x128xf32>
    %c0_45 = arith.constant 0 : index
    %c0_46 = arith.constant 0 : index
    %99 = vector.load %arg7[%c0_45, %c0_46] : memref<1x128xf32, #tpu.memory_space<vmem>>, vector<1x128xf32>
    %100 = vector.broadcast %99 : vector<1x128xf32> to vector<16x128xf32>
    %101 = arith.addf %98, %100 : vector<16x128xf32>
    %cst_47 = arith.constant 0.000000e+00 : f32
    %102 = vector.broadcast %cst_47 : f32 to vector<16x128xf32>
    %103 = arith.maximumf %101, %102 : vector<16x128xf32>
    %104 = arith.truncf %103 : vector<16x128xf32> to vector<16x128xbf16>
    %c0_48 = arith.constant 0 : index
    %c0_49 = arith.constant 0 : index
    %105 = vector.load %arg8[%c0_48, %c0_49] : memref<128x128xbf16, #tpu.memory_space<vmem>>, vector<128x128xbf16>
    %cst_50 = arith.constant dense<0.000000e+00> : vector<16x128xf32>
    %106 = tpu.matmul %104, %105, %cst_50 {dimension_numbers = #tpu.dot_dimension_numbers<[1], [0], [0], [1], [0, 0, 1, 1], [], []>} : vector<16x128xbf16>, vector<128x128xbf16>, vector<16x128xf32> -> vector<16x128xf32>
    %c0_51 = arith.constant 0 : index
    %c0_52 = arith.constant 0 : index
    %107 = vector.load %arg9[%c0_51, %c0_52] : memref<1x128xf32, #tpu.memory_space<vmem>>, vector<1x128xf32>
    %108 = vector.broadcast %107 : vector<1x128xf32> to vector<16x128xf32>
    %109 = arith.addf %106, %108 : vector<16x128xf32>
    %cst_53 = arith.constant 0.000000e+00 : f32
    %110 = vector.broadcast %cst_53 : f32 to vector<16x128xf32>
    %111 = arith.maximumf %109, %110 : vector<16x128xf32>
    %112 = tpu.iota {dimensions = array<i32: 1>} : vector<16x128xi32>
    %c10_i32 = arith.constant 10 : i32
    %113 = vector.broadcast %c10_i32 : i32 to vector<16x128xi32>
    %114 = arith.cmpi slt, %112, %113 : vector<16x128xi32>
    %cst_54 = arith.constant -1.000000e+30 : f32
    %115 = vector.broadcast %cst_54 : f32 to vector<16x128xf32>
    %116 = arith.select %114, %111, %115 : vector<16x128xi1>, vector<16x128xf32>
    %cst_55 = arith.constant dense<0xFF800000> : vector<16xf32>
    %117 = vector.multi_reduction <maximumf>, %116, %cst_55 [1] : vector<16x128xf32> to vector<16xf32>
    %118 = vector.shape_cast %117 : vector<16xf32> to vector<16x1xf32>
    %119 = vector.broadcast %118 : vector<16x1xf32> to vector<16x128xf32>
    %120 = arith.subf %116, %119 : vector<16x128xf32>
    %121 = math.exp %120 : vector<16x128xf32>
    %cst_56 = arith.constant dense<0.000000e+00> : vector<16xf32>
    %122 = vector.multi_reduction <add>, %121, %cst_56 [1] : vector<16x128xf32> to vector<16xf32>
    %123 = vector.shape_cast %122 : vector<16xf32> to vector<16x1xf32>
    %124 = math.log %123 : vector<16x1xf32>
    %125 = arith.addf %118, %124 : vector<16x1xf32>
    %126 = vector.broadcast %125 : vector<16x1xf32> to vector<16x128xf32>
    %127 = arith.subf %116, %126 : vector<16x128xf32>
    %c0_57 = arith.constant 0 : index
    %c0_58 = arith.constant 0 : index
    %128 = vector.load %arg10[%c0_57, %c0_58] : memref<16x128xf32, #tpu.memory_space<vmem>>, vector<16x128xf32>
    tpu.vector_store %arg10[%c0_57, %c0_58], %127 {strides = array<i32>} : memref<16x128xf32, #tpu.memory_space<vmem>>, vector<16x128xf32>,
    return
  }
  func.func @transform_0(%arg0: i32) -> (i32, i32, i32) {
    %c0_i32 = arith.constant 0 : i32
    %c0_i32_0 = arith.constant 0 : i32
    %c0_i32_1 = arith.constant 0 : i32
    return %c0_i32, %arg0, %c0_i32_0 : i32, i32, i32
  }
  func.func @transform_1(%arg0: i32) -> (i32, i32, i32) {
    %c0_i32 = arith.constant 0 : i32
    %c0_i32_0 = arith.constant 0 : i32
    %c0_i32_1 = arith.constant 0 : i32
    %c0_i32_2 = arith.constant 0 : i32
    return %c0_i32, %c0_i32_0, %c0_i32_1 : i32, i32, i32
  }
  func.func @transform_2(%arg0: i32) -> (i32, i32) {
    %c0_i32 = arith.constant 0 : i32
    %c0_i32_0 = arith.constant 0 : i32
    %c0_i32_1 = arith.constant 0 : i32
    return %c0_i32, %c0_i32_0 : i32, i32
  }
  func.func @transform_3(%arg0: i32) -> (i32, i32) {
    %c0_i32 = arith.constant 0 : i32
    %c0_i32_0 = arith.constant 0 : i32
    %c0_i32_1 = arith.constant 0 : i32
    return %c0_i32, %c0_i32_0 : i32, i32
  }
  func.func @transform_4(%arg0: i32) -> (i32, i32) {
    %c0_i32 = arith.constant 0 : i32
    %c0_i32_0 = arith.constant 0 : i32
    %c0_i32_1 = arith.constant 0 : i32
    return %c0_i32, %c0_i32_0 : i32, i32
  }
  func.func @transform_5(%arg0: i32) -> (i32, i32) {
    %c0_i32 = arith.constant 0 : i32
    %c0_i32_0 = arith.constant 0 : i32
    %c0_i32_1 = arith.constant 0 : i32
    return %c0_i32, %c0_i32_0 : i32, i32
  }
  func.func @transform_6(%arg0: i32) -> (i32, i32) {
    %c0_i32 = arith.constant 0 : i32
    %c0_i32_0 = arith.constant 0 : i32
    %c0_i32_1 = arith.constant 0 : i32
    return %c0_i32, %c0_i32_0 : i32, i32
  }
  func.func @transform_7(%arg0: i32) -> (i32, i32) {
    %c0_i32 = arith.constant 0 : i32
    %c0_i32_0 = arith.constant 0 : i32
    %c0_i32_1 = arith.constant 0 : i32
    return %c0_i32, %c0_i32_0 : i32, i32
  }
  func.func @transform_8(%arg0: i32) -> (i32, i32) {
    %c0_i32 = arith.constant 0 : i32
    %c0_i32_0 = arith.constant 0 : i32
    %c0_i32_1 = arith.constant 0 : i32
    return %c0_i32, %c0_i32_0 : i32, i32
  }
  func.func @transform_9(%arg0: i32) -> (i32, i32) {
    %c0_i32 = arith.constant 0 : i32
    %c0_i32_0 = arith.constant 0 : i32
    return %arg0, %c0_i32 : i32, i32
  }
}

</mosaic_0001>

<bundles_post_ra>
// kernel: forward.1
= control target key start
LH: loop header
LB: loop body
LE: loop exit
PB: predicated region body
PF: predicated region fallthrough
CT: control target
= control target key end

     0   :  { %v7538_v1 = vmov 0   ;;  %vm350_vm0 = vcmask 1045504   ;;  %vm277_vm1 = vcmask 228352   ;;  %vm6031_vm2 = vmmov 0   ;;  %s7528_s1 = inlined_call_operand.vmem [shape: bf16[5,28,256], index: 1, kind: input, shape index: {}]   ;;  %s7529_s0 = inlined_call_operand.vmem [shape: bf16[28,16,28], index: 0, kind: input, shape index: {}]   ;;  %s7530_s3 = inlined_call_operand.vmem [shape: bf16[640,256], index: 3, kind: input, shape index: {}]   ;;  %s7531_s2 = inlined_call_operand.vmem [shape: f32[1,128], index: 2, kind: input, shape index: {}]   ;;  %s7532_s5 = inlined_call_operand.vmem [shape: bf16[512,128], index: 5, kind: input, shape index: {}]   ;;  %s7533_s4 = inlined_call_operand.vmem [shape: f32[1,512], index: 4, kind: input, shape index: {}]   ;;  %s7534_s7 = inlined_call_operand.vmem [shape: bf16[128,128], index: 7, kind: input, shape index: {}]   ;;  %s7535_s6 = inlined_call_operand.vmem [shape: f32[1,128], index: 6, kind: input, shape index: {}]   ;;  %s7536_s8 = inlined_call_operand.vmem [shape: f32[1,128], index: 8, kind: input, shape index: {}]   ;;  %s7537_s9 = inlined_call_operand.vmem [shape: f32[16,128], index: 9, kind: output, shape index: {}]  }
   0x1   :  { %v5711_v0 = vld [vmem:[%s7528_s1 + $0x4] ss:$8 sps:$4 sm:$0xff]   ;;  %878 = vmatprep.mubr.bf16.mxu0 %v7538_v1  ;;  %389 = vmatprep.mubr.bf16.mxu1 %v7538_v1  ;;  %v5713_v2 = vld [vmem:[%s7528_s1] ss:$8 sps:$4 sm:$0xff]   ;;  %v5722_v14 = vld [vmem:[%s7529_s0 + $0x10] sm:$0xff]  }
   0x2   :  { %846 = vmatprep.subr.bf16.mxu0 %v5711_v0  ;;  %v5714_v3 = vld [vmem:[%s7528_s1 + $0x14] ss:$8 sps:$4 sm:$0x3f]   ;;  %v5716_v4 = vld [vmem:[%s7528_s1 + $0x10] ss:$8 sps:$4 sm:$0x3f]  }
   0x3   :  { %847 = vmatpush1.bf16.msra.mxu0 %v5713_v2  ;;  %v841_v5 = vsel %vm350_vm0, %v5716_v4, 0  ;;  %v5720_v6 = vld [vmem:[%s7528_s1 + $0x44] ss:$8 sps:$4 sm:$0xff]   ;;  %v5718_v8 = vld [vmem:[%s7528_s1 + $0x40] ss:$8 sps:$4 sm:$0xff]   ;;  %v5726_v21 = vld [vmem:[%s7529_s0 + $0x18] sm:$0xff]  }
   0x4   :  { %4720 = vmatprep.subr.msk.bf16.mxu0 %vm350_vm0, %v5714_v3  ;;  %v5717_v7 = vld [vmem:[%s7529_s0] sm:$0xff]   ;;  %v5723_v9 = vld [vmem:[%s7528_s1 + $0x54] ss:$8 sps:$4 sm:$0x3f]   ;;  %v5721_v13 = vld [vmem:[%s7529_s0 + $0x8] sm:$0xff]  }
   0x5   :  { %v5725_v10 = vld [vmem:[%s7528_s1 + $0x50] ss:$8 sps:$4 sm:$0x3f]   ;;  %v5731_v12 = vld [vmem:[%s7528_s1 + $0x64] ss:$8 sps:$4 sm:$0xff]  }
   0x6   :  { %v1384_v11 = vsel %vm350_vm0, %v5725_v10, 0  ;;  %v5740_v15 = vld [vmem:[%s7528_s1 + $0x24] ss:$8 sps:$4 sm:$0xff]   ;;  %v5742_v16 = vld [vmem:[%s7528_s1 + $0x20] ss:$8 sps:$4 sm:$0xff]   ;;  %v5749_v22 = vld [vmem:[%s7529_s0 + $0x10] sm:$0xff]  }
   0x7   :  { %849 = vmatpush1.bf16.msra.mxu0 %v841_v5  ;;  %357 = vmatprep.subr.bf16.mxu1 %v5740_v15  ;;  %v5744_v17 = vld [vmem:[%s7528_s1 + $0x34] ss:$8 sps:$4 sm:$0x3f]   ;;  %v5746_v18 = vld [vmem:[%s7528_s1 + $0x30] ss:$8 sps:$4 sm:$0x3f]  }
   0x8   :  { %1389 = vmatprep.subr.bf16.mxu0 %v5720_v6  ;;  %358 = vmatpush1.bf16.msra.mxu1 %v5742_v16  ;;  %v352_v19 = vsel %vm350_vm0, %v5746_v18, 0  ;;  %v5747_v20 = vld [vmem:[%s7529_s0 + $0x8] sm:$0xff]   ;;  %v5727_v23 = vld [vmem:[%s7529_s0 + $0x20] sm:$0xff]   ;;  %v5751_v24 = vld [vmem:[%s7529_s0 + $0x18] sm:$0xff]  }
   0x9   :  { %4667 = vmatprep.subr.msk.bf16.mxu1 %vm350_vm0, %v5744_v17  ;;  %v5728_v25 = vld [vmem:[%s7529_s0 + $0x10] sm:$0xff]   ;;  %v5729_v26 = vld [vmem:[%s7528_s1 + $0x60] ss:$8 sps:$4 sm:$0xff]   ;;  %v5732_v30 = vld [vmem:[%s7529_s0 + $0x18] sm:$0xff]  }
   0xa   :  { %4721 = vmatmul.mubr.msk.bf16.vlgmr.msra.gmra.mrb[0].mxu0 %vm277_vm1, %v5717_v7  ;;  %v5753_v27 = vld [vmem:[%s7528_s1 + $0x74] ss:$8 sps:$4 sm:$0x3f]   ;;  %v5755_v28 = vld [vmem:[%s7528_s1 + $0x70] ss:$8 sps:$4 sm:$0x3f]  }
   0xb   :  { %1390 = vmatpush1.bf16.msra.mxu0 %v5718_v8  ;;  %888 = vmatprep.mubr.bf16.mxu0 %v7538_v1  ;;  %v5756_v29 = vld [vmem:[%s7529_s0 + $0x20] sm:$0xff]   ;;  %v2023_v31 = vsel %vm350_vm0, %v5755_v28, 0  ;;  %v5758_v32 = vld [vmem:[%s7529_s0 + $0x28] sm:$0xff]   ;;  %v5760_v34 = vld [vmem:[%s7529_s0 + $0x30] sm:$0xff]  }
   0xc   :  { %4825 = vmatprep.subr.msk.bf16.mxu0 %vm350_vm0, %v5723_v9  ;;  %360 = vmatpush1.bf16.msra.mxu1 %v352_v19  ;;  %v5733_v33 = vld [vmem:[%s7529_s0 + $0x20] sm:$0xff]   ;;  %v5734_v35 = vld [vmem:[%s7529_s0 + $0x28] sm:$0xff]   ;;  %v5762_v36 = vld [vmem:[%s7529_s0 + $0x38] sm:$0xff]  }
   0xd   :  { %5256 = vmatprep.subr.bf16.mxu1 %v5711_v0  ;;  %v5735_v37 = vld [vmem:[%s7529_s0 + $0x30] sm:$0xff]   ;;  %v5764_v38 = vld [vmem:[%s7529_s0 + $0x40] sm:$0xff]   ;;  %v5736_v39 = vld [vmem:[%s7529_s0 + $0x38] sm:$0xff]  }
   0xe   :  { %v5766_v40 = vld [vmem:[%s7529_s0 + $0x48] sm:$0xff]   ;;  %v5737_v41 = vld [vmem:[%s7529_s0 + $0x40] sm:$0xff]   ;;  %v5768_v42 = vld [vmem:[%s7529_s0 + $0x50] sm:$0xff]  }
   0xf   :  { %1392 = vmatpush1.bf16.msra.mxu0 %v1384_v11  ;;  %4668 = vmatmul.mubr.msk.bf16.vlgmr.msra.gmra.mrb[0].mxu1 %vm277_vm1, %v5747_v20  ;;  %v5738_v43 = vld [vmem:[%s7529_s0 + $0x48] sm:$0xff]   ;;  %v5770_v44 = vld [vmem:[%s7529_s0 + $0x58] sm:$0xff]   ;;  %v5739_v45 = vld [vmem:[%s7529_s0 + $0x50] sm:$0xff]  }
  0x10   :  { %2028 = vmatprep.subr.bf16.mxu0 %v5731_v12  ;;  %399 = vmatprep.mubr.bf16.mxu1 %v7538_v1  ;;  %v5782_v46 = vld [vmem:[%s7528_s1 + $0x84] ss:$8 sps:$4 sm:$0xff]   ;;  %v5743_v48 = vld [vmem:[%s7529_s0 + $0x58] sm:$0xff]   ;;  %v5776_v51 = vld [vmem:[%s7529_s0 + $0x70] sm:$0xff]  }
  0x11   :  { %5258 = vmatpush1.bf16.msra.mxu1 %v5713_v2  ;;  %v5772_v47 = vld [vmem:[%s7529_s0 + $0x60] sm:$0xff]   ;;  %v5774_v49 = vld [vmem:[%s7529_s0 + $0x68] sm:$0xff]   ;;  %v5778_v53 = vld [vmem:[%s7529_s0 + $0x78] sm:$0xff]  }
  0x12   :  { %4722 = vmatmul.mubr.msk.bf16.gmra.mrb[4].mxu0 %vm277_vm1, %v5721_v13  ;;  %5257 = vmatprep.subr.msk.bf16.mxu1 %vm350_vm0, %v5714_v3  ;;  %v5748_v50 = vld [vmem:[%s7529_s0 + $0x60] sm:$0xff]   ;;  %v5750_v52 = vld [vmem:[%s7529_s0 + $0x68] sm:$0xff]   ;;  %v5752_v54 = vld [vmem:[%s7529_s0 + $0x70] sm:$0xff]  }
  0x13   :  { %898 = vmatprep.mubr.bf16.mxu0 %v7538_v1  ;;  %v5783_v55 = vld [vmem:[%s7529_s0 + $0x80] sm:$0xff]   ;;  %v5757_v56 = vld [vmem:[%s7529_s0 + $0x78] sm:$0xff]   ;;  %v5785_v57 = vld [vmem:[%s7529_s0 + $0x88] sm:$0xff]  }
  0x14   :  { %v5759_v58 = vld [vmem:[%s7529_s0 + $0x80] sm:$0xff]   ;;  %v5787_v59 = vld [vmem:[%s7529_s0 + $0x90] sm:$0xff]   ;;  %v5761_v60 = vld [vmem:[%s7529_s0 + $0x88] sm:$0xff]  }
  0x15   :  { %5259 = vmatpush1.bf16.msra.mxu1 %v841_v5  ;;  %v5789_v61 = vld [vmem:[%s7529_s0 + $0x98] sm:$0xff]   ;;  %v5763_v62 = vld [vmem:[%s7529_s0 + $0x90] sm:$0xff]   ;;  %v5791_v63 = vld [vmem:[%s7529_s0 + $0xa0] sm:$0xff]  }
  0x16   :  { %v5765_v0 = vld [vmem:[%s7529_s0 + $0x98] sm:$0xff]   ;;  %v5793_v2 = vld [vmem:[%s7529_s0 + $0xa8] sm:$0xff]   ;;  %v5767_v3 = vld [vmem:[%s7529_s0 + $0xa0] sm:$0xff]  }
  0x17   :  { %4669 = vmatmul.mubr.msk.bf16.gmra.mrb[4].mxu1 %vm277_vm1, %v5749_v22  ;;  %v5795_v4 = vld [vmem:[%s7529_s0 + $0xb0] sm:$0xff]   ;;  %v5769_v5 = vld [vmem:[%s7529_s0 + $0xa8] sm:$0xff]   ;;  %v5797_v6 = vld [vmem:[%s7529_s0 + $0xb8] sm:$0xff]  }
  0x18   :  { %409 = vmatprep.mubr.bf16.mxu1 %v7538_v1  ;;  %v5771_v7 = vld [vmem:[%s7529_s0 + $0xb0] sm:$0xff]   ;;  %v5799_v8 = vld [vmem:[%s7529_s0 + $0xc0] sm:$0xff]   ;;  %v5773_v9 = vld [vmem:[%s7529_s0 + $0xb8] sm:$0xff]  }
  0x19   :  { %v5801_v10 = vld [vmem:[%s7529_s0 + $0x28] sm:$0xff]   ;;  %v5775_v11 = vld [vmem:[%s7529_s0 + $0xc0] sm:$0xff]   ;;  %v5803_v12 = vld [vmem:[%s7529_s0 + $0x30] sm:$0xff]  }
  0x1a   :  { %4723 = vmatmul.mubr.msk.bf16.gmra.mrb[8].mxu0 %vm277_vm1, %v5722_v14  ;;  %v5777_v13 = vld [vmem:[%s7529_s0 + $0xc8] sm:$0xff]   ;;  %v5805_v14 = vld [vmem:[%s7529_s0 + $0x38] sm:$0xff]   ;;  %v5810_v20 = vld [vmem:[%s7529_s0 + $0x40] sm:$0xff]  }
  0x1b   :  { %908 = vmatprep.mubr.bf16.mxu0 %v7538_v1  ;;  %v5779_v15 = vld [vmem:[%s7529_s0 + $0x18] sm:$0xff]   ;;  %v5780_v16 = vld [vmem:[%s7528_s1 + $0x80] ss:$8 sps:$4 sm:$0xff]  }
  0x1c   :  { %v5807_v17 = vld [vmem:[%s7528_s1 + $0x94] ss:$8 sps:$4 sm:$0x3f]   ;;  %v5809_v18 = vld [vmem:[%s7528_s1 + $0x90] ss:$8 sps:$4 sm:$0x3f]  }
  0x1d   :  { %v2662_v19 = vsel %vm350_vm0, %v5809_v18, 0  ;;  %v5812_v22 = vld [vmem:[%s7529_s0 + $0x48] sm:$0xff]   ;;  %v5818_v28 = vld [vmem:[%s7529_s0 + $0x60] sm:$0xff]  }
  0x1f   :  { %4670 = vmatmul.mubr.msk.bf16.gmra.mrb[8].mxu1 %vm277_vm1, %v5751_v24  ;;  %v5814_v24 = vld [vmem:[%s7529_s0 + $0x50] sm:$0xff]  }
  0x20   :  { %419 = vmatprep.mubr.bf16.mxu1 %v7538_v1 }
  0x22   :  { %4724 = vmatmul.mubr.msk.bf16.gmra.mrb[12].mxu0 %vm277_vm1, %v5726_v21  ;;  %v5784_v21 = vld [vmem:[%s7529_s0 + $0x20] sm:$0xff]  }
  0x23   :  { %918 = vmatprep.mubr.bf16.mxu0 %v7538_v1 }
  0x27   :  { %4671 = vmatmul.mubr.msk.bf16.gmra.mrb[12].mxu1 %vm277_vm1, %v5756_v29  ;;  %v5792_v29 = vld [vmem:[%s7529_s0 + $0x40] sm:$0xff]  }
  0x28   :  { %429 = vmatprep.mubr.bf16.mxu1 %v7538_v1 }
  0x2a   :  { %4725 = vmatmul.mubr.msk.bf16.gmra.mrb[16].mxu0 %vm277_vm1, %v5727_v23  ;;  %v5786_v23 = vld [vmem:[%s7529_s0 + $0x28] sm:$0xff]  }
  0x2b   :  { %1421 = vmatprep.mubr.bf16.mxu0 %v7538_v1 }
  0x2f   :  { %4672 = vmatmul.mubr.msk.bf16.gmra.mrb[16].mxu1 %vm277_vm1, %v5758_v32  ;;  %v5822_v32 = vld [vmem:[%s7529_s0 + $0x70] sm:$0xff]  }
  0x30   :  { %439 = vmatprep.mubr.bf16.mxu1 %v7538_v1 }
  0x32   :  { %4826 = vmatmul.mubr.msk.bf16.vlgmr.msra.gmra.mrb[0].mxu0 %vm277_vm1, %v5728_v25  ;;  %v5788_v25 = vld [vmem:[%s7529_s0 + $0x30] sm:$0xff]  }
  0x33   :  { %2029 = vmatpush1.bf16.msra.mxu0 %v5729_v26  ;;  %1431 = vmatprep.mubr.bf16.mxu0 %v7538_v1  ;;  %v5816_v26 = vld [vmem:[%s7529_s0 + $0x58] sm:$0xff]  }
  0x34   :  { %4930 = vmatprep.subr.msk.bf16.mxu0 %vm350_vm0, %v5753_v27  ;;  %v5790_v27 = vld [vmem:[%s7529_s0 + $0x38] sm:$0xff]  }
  0x37   :  { %2031 = vmatpush1.bf16.msra.mxu0 %v2023_v31  ;;  %4673 = vmatmul.mubr.msk.bf16.gmra.mrb[20].mxu1 %vm277_vm1, %v5760_v34  ;;  %v5794_v31 = vld [vmem:[%s7529_s0 + $0x48] sm:$0xff]   ;;  %v5824_v34 = vld [vmem:[%s7529_s0 + $0x78] sm:$0xff]  }
  0x38   :  { %449 = vmatprep.mubr.bf16.mxu1 %v7538_v1  ;;  %2667 = vmatprep.subr.bf16.mxu0 %v5782_v46  ;;  %v5836_v46 = vld [vmem:[%s7529_s0 + $0xa8] sm:$0xff]  }
  0x3a   :  { %4827 = vmatmul.mubr.msk.bf16.gmra.mrb[4].mxu0 %vm277_vm1, %v5732_v30  ;;  %v5820_v30 = vld [vmem:[%s7529_s0 + $0x68] sm:$0xff]  }
  0x3b   :  { %1441 = vmatprep.mubr.bf16.mxu0 %v7538_v1 }
  0x3f   :  { %4674 = vmatmul.mubr.msk.bf16.gmra.mrb[24].mxu1 %vm277_vm1, %v5762_v36  ;;  %v5826_v36 = vld [vmem:[%s7529_s0 + $0x80] sm:$0xff]  }
  0x40   :  { %459 = vmatprep.mubr.bf16.mxu1 %v7538_v1 }
  0x42   :  { %4828 = vmatmul.mubr.msk.bf16.gmra.mrb[8].mxu0 %vm277_vm1, %v5733_v33  ;;  %v5796_v33 = vld [vmem:[%s7529_s0 + $0x50] sm:$0xff]  }
  0x43   :  { %1451 = vmatprep.mubr.bf16.mxu0 %v7538_v1 }
  0x47   :  { %4675 = vmatmul.mubr.msk.bf16.gmra.mrb[28].mxu1 %vm277_vm1, %v5764_v38  ;;  %v5828_v38 = vld [vmem:[%s7529_s0 + $0x88] sm:$0xff]  }
  0x48   :  { %469 = vmatprep.mubr.bf16.mxu1 %v7538_v1 }
  0x4a   :  { %4829 = vmatmul.mubr.msk.bf16.gmra.mrb[12].mxu0 %vm277_vm1, %v5734_v35  ;;  %v5798_v35 = vld [vmem:[%s7529_s0 + $0x58] sm:$0xff]  }
  0x4b   :  { %1461 = vmatprep.mubr.bf16.mxu0 %v7538_v1 }
  0x4f   :  { %4676 = vmatmul.mubr.msk.bf16.gmra.mrb[32].mxu1 %vm277_vm1, %v5766_v40  ;;  %v5830_v40 = vld [vmem:[%s7529_s0 + $0x90] sm:$0xff]  }
  0x50   :  { %479 = vmatprep.mubr.bf16.mxu1 %v7538_v1 }
  0x52   :  { %4830 = vmatmul.mubr.msk.bf16.gmra.mrb[16].mxu0 %vm277_vm1, %v5735_v37  ;;  %v5800_v37 = vld [vmem:[%s7529_s0 + $0x60] sm:$0xff]  }
  0x53   :  { %1471 = vmatprep.mubr.bf16.mxu0 %v7538_v1 }
  0x57   :  { %4677 = vmatmul.mubr.msk.bf16.gmra.mrb[36].mxu1 %vm277_vm1, %v5768_v42  ;;  %v5832_v42 = vld [vmem:[%s7529_s0 + $0x98] sm:$0xff]  }
  0x58   :  { %489 = vmatprep.mubr.bf16.mxu1 %v7538_v1 }
  0x5a   :  { %4831 = vmatmul.mubr.msk.bf16.gmra.mrb[20].mxu0 %vm277_vm1, %v5736_v39  ;;  %v5802_v39 = vld [vmem:[%s7529_s0 + $0x68] sm:$0xff]  }
  0x5b   :  { %1481 = vmatprep.mubr.bf16.mxu0 %v7538_v1 }
  0x5f   :  { %4678 = vmatmul.mubr.msk.bf16.gmra.mrb[40].mxu1 %vm277_vm1, %v5770_v44  ;;  %v5834_v44 = vld [vmem:[%s7529_s0 + $0xa0] sm:$0xff]  }
  0x60   :  { %499 = vmatprep.mubr.bf16.mxu1 %v7538_v1 }
  0x62   :  { %4832 = vmatmul.mubr.msk.bf16.gmra.mrb[24].mxu0 %vm277_vm1, %v5737_v41  ;;  %v5804_v41 = vld [vmem:[%s7529_s0 + $0x70] sm:$0xff]  }
  0x63   :  { %1491 = vmatprep.mubr.bf16.mxu0 %v7538_v1 }
  0x67   :  { %4679 = vmatmul.mubr.msk.bf16.gmra.mrb[44].mxu1 %vm277_vm1, %v5772_v47  ;;  %v5813_v47 = vld [vmem:[%s7529_s0 + $0x88] sm:$0xff]  }
  0x68   :  { %509 = vmatprep.mubr.bf16.mxu1 %v7538_v1 }
  0x6a   :  { %4833 = vmatmul.mubr.msk.bf16.gmra.mrb[28].mxu0 %vm277_vm1, %v5738_v43  ;;  %v5806_v43 = vld [vmem:[%s7529_s0 + $0x78] sm:$0xff]  }
  0x6b   :  { %1501 = vmatprep.mubr.bf16.mxu0 %v7538_v1 }
  0x6f   :  { %4680 = vmatmul.mubr.msk.bf16.gmra.mrb[48].mxu1 %vm277_vm1, %v5774_v49  ;;  %v5815_v49 = vld [vmem:[%s7529_s0 + $0x90] sm:$0xff]  }
  0x70   :  { %519 = vmatprep.mubr.bf16.mxu1 %v7538_v1 }
  0x72   :  { %4834 = vmatmul.mubr.msk.bf16.gmra.mrb[32].mxu0 %vm277_vm1, %v5739_v45  ;;  %v5811_v45 = vld [vmem:[%s7529_s0 + $0x80] sm:$0xff]  }
  0x73   :  { %1511 = vmatprep.mubr.bf16.mxu0 %v7538_v1 }
  0x77   :  { %4681 = vmatmul.mubr.msk.bf16.gmra.mrb[52].mxu1 %vm277_vm1, %v5776_v51 }
  0x78   :  { %529 = vmatprep.mubr.bf16.mxu1 %v7538_v1 }
  0x7a   :  { %4835 = vmatmul.mubr.msk.bf16.gmra.mrb[36].mxu0 %vm277_vm1, %v5743_v48  ;;  %v5838_v48 = vld [vmem:[%s7529_s0 + $0xb0] sm:$0xff]  }
  0x7b   :  { %1521 = vmatprep.mubr.bf16.mxu0 %v7538_v1 }
  0x7f   :  { %4682 = vmatmul.mubr.msk.bf16.gmra.mrb[56].mxu1 %vm277_vm1, %v5778_v53 }
  0x80   :  { %539 = vmatprep.mubr.bf16.mxu1 %v7538_v1 }
  0x82   :  { %4836 = vmatmul.mubr.msk.bf16.gmra.mrb[40].mxu0 %vm277_vm1, %v5748_v50 }
  0x83   :  { %1531 = vmatprep.mubr.bf16.mxu0 %v7538_v1 }
  0x87   :  { %4683 = vmatmul.mubr.msk.bf16.gmra.mrb[60].mxu1 %vm277_vm1, %v5783_v55  ;;  %v5817_v55 = vld [vmem:[%s7529_s0 + $0x98] sm:$0xff]  }
  0x88   :  { %549 = vmatprep.mubr.bf16.mxu1 %v7538_v1 }
  0x8a   :  { %4837 = vmatmul.mubr.msk.bf16.gmra.mrb[44].mxu0 %vm277_vm1, %v5750_v52  ;;  %v5840_v52 = vld [vmem:[%s7529_s0 + $0xb8] sm:$0xff]  }
  0x8b   :  { %1541 = vmatprep.mubr.bf16.mxu0 %v7538_v1 }
  0x8f   :  { %4684 = vmatmul.mubr.msk.bf16.gmra.mrb[64].mxu1 %vm277_vm1, %v5785_v57 }
  0x90   :  { %559 = vmatprep.mubr.bf16.mxu1 %v7538_v1 }
  0x92   :  { %4838 = vmatmul.mubr.msk.bf16.gmra.mrb[48].mxu0 %vm277_vm1, %v5752_v54 }
  0x93   :  { %1551 = vmatprep.mubr.bf16.mxu0 %v7538_v1 }
  0x97   :  { %4685 = vmatmul.mubr.msk.bf16.gmra.mrb[68].mxu1 %vm277_vm1, %v5787_v59 }
  0x98   :  { %569 = vmatprep.mubr.bf16.mxu1 %v7538_v1 }
  0x9a   :  { %4839 = vmatmul.mubr.msk.bf16.gmra.mrb[52].mxu0 %vm277_vm1, %v5757_v56 }
  0x9b   :  { %1561 = vmatprep.mubr.bf16.mxu0 %v7538_v1 }
  0x9f   :  { %4686 = vmatmul.mubr.msk.bf16.gmra.mrb[72].mxu1 %vm277_vm1, %v5789_v61 }
  0xa0   :  { %579 = vmatprep.mubr.bf16.mxu1 %v7538_v1 }
  0xa2   :  { %4840 = vmatmul.mubr.msk.bf16.gmra.mrb[56].mxu0 %vm277_vm1, %v5759_v58 }
  0xa3   :  { %1571 = vmatprep.mubr.bf16.mxu0 %v7538_v1 }
  0xa7   :  { %4687 = vmatmul.mubr.msk.bf16.gmra.mrb[76].mxu1 %vm277_vm1, %v5791_v63 }
  0xa8   :  { %589 = vmatprep.mubr.bf16.mxu1 %v7538_v1 }
  0xaa   :  { %4841 = vmatmul.mubr.msk.bf16.gmra.mrb[60].mxu0 %vm277_vm1, %v5761_v60  ;;  %v5819_v60 = vld [vmem:[%s7529_s0 + $0xa0] sm:$0xff]  }
  0xab   :  { %1581 = vmatprep.mubr.bf16.mxu0 %v7538_v1 }
  0xaf   :  { %4688 = vmatmul.mubr.msk.bf16.gmra.mrb[80].mxu1 %vm277_vm1, %v5793_v2  ;;  %v5821_v2 = vld [vmem:[%s7529_s0 + $0xa8] sm:$0xff]  }
  0xb0   :  { %599 = vmatprep.mubr.bf16.mxu1 %v7538_v1 }
  0xb2   :  { %4842 = vmatmul.mubr.msk.bf16.gmra.mrb[64].mxu0 %vm277_vm1, %v5763_v62 }
  0xb3   :  { %1591 = vmatprep.mubr.bf16.mxu0 %v7538_v1 }
  0xb7   :  { %4689 = vmatmul.mubr.msk.bf16.gmra.mrb[84].mxu1 %vm277_vm1, %v5795_v4 }
  0xb8   :  { %609 = vmatprep.mubr.bf16.mxu1 %v7538_v1 }
  0xba   :  { %4843 = vmatmul.mubr.msk.bf16.gmra.mrb[68].mxu0 %vm277_vm1, %v5765_v0 }
  0xbb   :  { %1601 = vmatprep.mubr.bf16.mxu0 %v7538_v1 }
  0xbf   :  { %4690 = vmatmul.mubr.msk.bf16.gmra.mrb[88].mxu1 %vm277_vm1, %v5797_v6 }
  0xc0   :  { %619 = vmatprep.mubr.bf16.mxu1 %v7538_v1 }
  0xc2   :  { %4844 = vmatmul.mubr.msk.bf16.gmra.mrb[72].mxu0 %vm277_vm1, %v5767_v3 }
  0xc3   :  { %1611 = vmatprep.mubr.bf16.mxu0 %v7538_v1 }
  0xc7   :  { %4691 = vmatmul.mubr.msk.bf16.gmra.mrb[92].mxu1 %vm277_vm1, %v5799_v8 }
  0xc8   :  { %928 = vmatprep.mubr.bf16.mxu1 %v7538_v1 }
  0xca   :  { %4845 = vmatmul.mubr.msk.bf16.gmra.mrb[76].mxu0 %vm277_vm1, %v5769_v5 }
  0xcb   :  { %1621 = vmatprep.mubr.bf16.mxu0 %v7538_v1 }
  0xcf   :  { %4726 = vmatmul.mubr.msk.bf16.vlgmr.msra.gmra.mrb[20].mxu1 %vm277_vm1, %v5801_v10 }
  0xd0   :  { %938 = vmatprep.mubr.bf16.mxu1 %v7538_v1 }
  0xd2   :  { %4846 = vmatmul.mubr.msk.bf16.gmra.mrb[80].mxu0 %vm277_vm1, %v5771_v7  ;;  %v5823_v7 = vld [vmem:[%s7529_s0 + $0xb0] sm:$0xff]  }
  0xd3   :  { %1631 = vmatprep.mubr.bf16.mxu0 %v7538_v1 }
  0xd7   :  { %4727 = vmatmul.mubr.msk.bf16.gmra.mrb[24].mxu1 %vm277_vm1, %v5803_v12  ;;  %v5825_v12 = vld [vmem:[%s7529_s0 + $0xb8] sm:$0xff]  }
  0xd8   :  { %948 = vmatprep.mubr.bf16.mxu1 %v7538_v1 }
  0xda   :  { %4847 = vmatmul.mubr.msk.bf16.gmra.mrb[84].mxu0 %vm277_vm1, %v5773_v9 }
  0xdb   :  { %1641 = vmatprep.mubr.bf16.mxu0 %v7538_v1 }
  0xdf   :  { %4728 = vmatmul.mubr.msk.bf16.gmra.mrb[28].mxu1 %vm277_vm1, %v5805_v14  ;;  %v5829_v14 = vld [vmem:[%s7529_s0 + $0xc8] sm:$0xff]  }
  0xe0   :  { %958 = vmatprep.mubr.bf16.mxu1 %v7538_v1 }
  0xe2   :  { %4848 = vmatmul.mubr.msk.bf16.gmra.mrb[88].mxu0 %vm277_vm1, %v5775_v11  ;;  %v6589_v50 = vpop.f32.mrb[0].mxu1 }
  0xe3   :  { %1651 = vmatprep.mubr.bf16.mxu0 %v7538_v1  ;;  %v6592_v51 = vpop.f32.mrb[1].mxu1 }
  0xe4   :  { %v6597_v53 = vpop.f32.mrb[2].mxu1 }
  0xe5   :  { %v6599_v54 = vpop.f32.mrb[3].mxu1 }
  0xe7   :  { %4729 = vmatmul.mubr.msk.bf16.gmra.mrb[32].mxu1 %vm277_vm1, %v5810_v20  ;;  %v5835_v20 = vld [vmem:[%s7529_s0 + $0x28] sm:$0xff]  }
  0xe8   :  { %968 = vmatprep.mubr.bf16.mxu1 %v7538_v1 }
  0xea   :  { %4849 = vmatmul.mubr.msk.bf16.gmra.mrb[92].mxu0 %vm277_vm1, %v5777_v13  ;;  %v6606_v56 = vpop.f32.mrb[4].mxu1  ;;  %v5827_v13 = vld [vmem:[%s7529_s0 + $0xc0] sm:$0xff]  }
  0xeb   :  { %2060 = vmatprep.mubr.bf16.mxu0 %v7538_v1  ;;  %v6609_v57 = vpop.f32.mrb[5].mxu1 }
  0xec   :  { %v6611_v58 = vpop.f32.mrb[6].mxu1 }
  0xed   :  { %v6613_v59 = vpop.f32.mrb[7].mxu1 }
  0xef   :  { %4730 = vmatmul.mubr.msk.bf16.gmra.mrb[36].mxu1 %vm277_vm1, %v5812_v22 }
  0xf0   :  { %978 = vmatprep.mubr.bf16.mxu1 %v7538_v1 }
  0xf2   :  { %4931 = vmatmul.mubr.msk.bf16.vlgmr.msra.gmra.mrb[0].mxu0 %vm277_vm1, %v5779_v15  ;;  %v6619_v61 = vpop.f32.mrb[8].mxu1  ;;  %v5831_v15 = vld [vmem:[%s7529_s0 + $0xd0] sm:$0xff]  }
  0xf3   :  { %2668 = vmatpush1.bf16.msra.mxu0 %v5780_v16  ;;  %2070 = vmatprep.mubr.bf16.mxu0 %v7538_v1  ;;  %v6622_v62 = vpop.f32.mrb[9].mxu1  ;;  %v5833_v16 = vld [vmem:[%s7529_s0 + $0x20] sm:$0xff]  }
  0xf4   :  { %5035 = vmatprep.subr.msk.bf16.mxu0 %vm350_vm0, %v5807_v17  ;;  %v6624_v63 = vpop.f32.mrb[10].mxu1 }
  0xf5   :  { %v6626_v0 = vpop.f32.mrb[11].mxu1 }
  0xf7   :  { %2670 = vmatpush1.bf16.msra.mxu0 %v2662_v19  ;;  %4731 = vmatmul.mubr.msk.bf16.gmra.mrb[40].mxu1 %vm277_vm1, %v5814_v24 }
  0xf8   :  { %988 = vmatprep.mubr.bf16.mxu1 %v7538_v1 }
  0xfa   :  { %4932 = vmatmul.mubr.msk.bf16.gmra.mrb[4].mxu0 %vm277_vm1, %v5784_v21  ;;  %v6632_v3 = vpop.f32.mrb[12].mxu1 }
  0xfb   :  { %2080 = vmatprep.mubr.bf16.mxu0 %v7538_v1  ;;  %v6635_v4 = vpop.f32.mrb[13].mxu1 }
  0xfc   :  { %v6637_v5 = vpop.f32.mrb[14].mxu1 }
  0xfd   :  { %v6639_v6 = vpop.f32.mrb[15].mxu1 }
  0xff   :  { %4732 = vmatmul.mubr.msk.bf16.gmra.mrb[44].mxu1 %vm277_vm1, %v5816_v26 }
 0x100   :  { %998 = vmatprep.mubr.bf16.mxu1 %v7538_v1 }
 0x102   :  { %4933 = vmatmul.mubr.msk.bf16.gmra.mrb[8].mxu0 %vm277_vm1, %v5786_v23  ;;  %v6645_v8 = vpop.f32.mrb[16].mxu1 }
 0x103   :  { %2090 = vmatprep.mubr.bf16.mxu0 %v7538_v1  ;;  %v6648_v9 = vpop.f32.mrb[17].mxu1 }
 0x104   :  { %v6650_v10 = vpop.f32.mrb[18].mxu1 }
 0x105   :  { %v6652_v11 = vpop.f32.mrb[19].mxu1 }
 0x107   :  { %4733 = vmatmul.mubr.msk.bf16.gmra.mrb[48].mxu1 %vm277_vm1, %v5818_v28 }
 0x108   :  { %1008 = vmatprep.mubr.bf16.mxu1 %v7538_v1 }
 0x10a   :  { %4934 = vmatmul.mubr.msk.bf16.gmra.mrb[12].mxu0 %vm277_vm1, %v5788_v25  ;;  %v5837_v25 = vld [vmem:[%s7529_s0 + $0x30] sm:$0xff]  }
 0x10b   :  { %2100 = vmatprep.mubr.bf16.mxu0 %v7538_v1 }
 0x10f   :  { %4734 = vmatmul.mubr.msk.bf16.gmra.mrb[52].mxu1 %vm277_vm1, %v5820_v30  ;;  %v5839_v30 = vld [vmem:[%s7529_s0 + $0x38] sm:$0xff]  }
 0x110   :  { %1018 = vmatprep.mubr.bf16.mxu1 %v7538_v1 }
 0x112   :  { %4935 = vmatmul.mubr.msk.bf16.gmra.mrb[16].mxu0 %vm277_vm1, %v5790_v27 }
 0x113   :  { %2110 = vmatprep.mubr.bf16.mxu0 %v7538_v1 }
 0x117   :  { %4735 = vmatmul.mubr.msk.bf16.gmra.mrb[56].mxu1 %vm277_vm1, %v5822_v32 }
 0x118   :  { %1028 = vmatprep.mubr.bf16.mxu1 %v7538_v1 }
 0x11a   :  { %4936 = vmatmul.mubr.msk.bf16.gmra.mrb[20].mxu0 %vm277_vm1, %v5792_v29 }
 0x11b   :  { %2120 = vmatprep.mubr.bf16.mxu0 %v7538_v1 }
 0x11f   :  { %4736 = vmatmul.mubr.msk.bf16.gmra.mrb[60].mxu1 %vm277_vm1, %v5824_v34 }
 0x120   :  { %1038 = vmatprep.mubr.bf16.mxu1 %v7538_v1 }
 0x122   :  { %4937 = vmatmul.mubr.msk.bf16.gmra.mrb[24].mxu0 %vm277_vm1, %v5794_v31 }
 0x123   :  { %2130 = vmatprep.mubr.bf16.mxu0 %v7538_v1 }
 0x127   :  { %4737 = vmatmul.mubr.msk.bf16.gmra.mrb[64].mxu1 %vm277_vm1, %v5826_v36 }
 0x128   :  { %1048 = vmatprep.mubr.bf16.mxu1 %v7538_v1 }
 0x12a   :  { %4938 = vmatmul.mubr.msk.bf16.gmra.mrb[28].mxu0 %vm277_vm1, %v5796_v33 }
 0x12b   :  { %2140 = vmatprep.mubr.bf16.mxu0 %v7538_v1 }
 0x12f   :  { %4738 = vmatmul.mubr.msk.bf16.gmra.mrb[68].mxu1 %vm277_vm1, %v5828_v38 }
 0x130   :  { %1058 = vmatprep.mubr.bf16.mxu1 %v7538_v1 }
 0x132   :  { %4939 = vmatmul.mubr.msk.bf16.gmra.mrb[32].mxu0 %vm277_vm1, %v5798_v35  ;;  %v5841_v35 = vld [vmem:[%s7529_s0 + $0x40] sm:$0xff]  }
 0x133   :  { %2150 = vmatprep.mubr.bf16.mxu0 %v7538_v1 }
 0x137   :  { %4739 = vmatmul.mubr.msk.bf16.gmra.mrb[72].mxu1 %vm277_vm1, %v5830_v40  ;;  %v5842_v40 = vld [vmem:[%s7529_s0 + $0x48] sm:$0xff]  }
 0x138   :  { %1068 = vmatprep.mubr.bf16.mxu1 %v7538_v1 }
 0x13a   :  { %4940 = vmatmul.mubr.msk.bf16.gmra.mrb[36].mxu0 %vm277_vm1, %v5800_v37 }
 0x13b   :  { %2160 = vmatprep.mubr.bf16.mxu0 %v7538_v1 }
 0x13f   :  { %4740 = vmatmul.mubr.msk.bf16.gmra.mrb[76].mxu1 %vm277_vm1, %v5832_v42 }
 0x140   :  { %1078 = vmatprep.mubr.bf16.mxu1 %v7538_v1 }
 0x142   :  { %4941 = vmatmul.mubr.msk.bf16.gmra.mrb[40].mxu0 %vm277_vm1, %v5802_v39 }
 0x143   :  { %2170 = vmatprep.mubr.bf16.mxu0 %v7538_v1 }
 0x147   :  { %4741 = vmatmul.mubr.msk.bf16.gmra.mrb[80].mxu1 %vm277_vm1, %v5834_v44 }
 0x148   :  { %1088 = vmatprep.mubr.bf16.mxu1 %v7538_v1 }
 0x14a   :  { %4942 = vmatmul.mubr.msk.bf16.gmra.mrb[44].mxu0 %vm277_vm1, %v5804_v41 }
 0x14b   :  { %2180 = vmatprep.mubr.bf16.mxu0 %v7538_v1 }
 0x14f   :  { %4742 = vmatmul.mubr.msk.bf16.gmra.mrb[84].mxu1 %vm277_vm1, %v5836_v46 }
 0x150   :  { %1098 = vmatprep.mubr.bf16.mxu1 %v7538_v1 }
 0x152   :  { %4943 = vmatmul.mubr.msk.bf16.gmra.mrb[48].mxu0 %vm277_vm1, %v5806_v43 }
 0x153   :  { %2190 = vmatprep.mubr.bf16.mxu0 %v7538_v1 }
 0x157   :  { %4743 = vmatmul.mubr.msk.bf16.gmra.mrb[88].mxu1 %vm277_vm1, %v5838_v48 }
 0x158   :  { %1108 = vmatprep.mubr.bf16.mxu1 %v7538_v1 }
 0x15a   :  { %4944 = vmatmul.mubr.msk.bf16.gmra.mrb[52].mxu0 %vm277_vm1, %v5811_v45  ;;  %v5843_v45 = vld [vmem:[%s7529_s0 + $0x50] sm:$0xff]  }
 0x15b   :  { %2200 = vmatprep.mubr.bf16.mxu0 %v7538_v1 }
 0x15f   :  { %4744 = vmatmul.mubr.msk.bf16.gmra.mrb[92].mxu1 %vm277_vm1, %v5840_v52  ;;  %v5844_v52 = vld [vmem:[%s7529_s0 + $0x58] sm:$0xff]  }
 0x162   :  { %4945 = vmatmul.mubr.msk.bf16.gmra.mrb[56].mxu0 %vm277_vm1, %v5813_v47 }
 0x163   :  { %2210 = vmatprep.mubr.bf16.mxu0 %v7538_v1 }
 0x16a   :  { %4946 = vmatmul.mubr.msk.bf16.gmra.mrb[60].mxu0 %vm277_vm1, %v5815_v49 }
 0x16b   :  { %2220 = vmatprep.mubr.bf16.mxu0 %v7538_v1 }
 0x172   :  { %4947 = vmatmul.mubr.msk.bf16.gmra.mrb[64].mxu0 %vm277_vm1, %v5817_v55 }
 0x173   :  { %2230 = vmatprep.mubr.bf16.mxu0 %v7538_v1 }
 0x17a   :  { %4948 = vmatmul.mubr.msk.bf16.gmra.mrb[68].mxu0 %vm277_vm1, %v5819_v60 }
 0x17b   :  { %2240 = vmatprep.mubr.bf16.mxu0 %v7538_v1 }
 0x182   :  { %4949 = vmatmul.mubr.msk.bf16.gmra.mrb[72].mxu0 %vm277_vm1, %v5821_v2  ;;  %v5861_v2 = vld [vmem:[%s7530_s3 + $0x100] ss:$8 sps:$4 sm:$0xff]  }
 0x183   :  { %2250 = vmatprep.mubr.bf16.mxu0 %v7538_v1 }
 0x18a   :  { %4950 = vmatmul.mubr.msk.bf16.gmra.mrb[76].mxu0 %vm277_vm1, %v5823_v7 }
 0x18b   :  { %2260 = vmatprep.mubr.bf16.mxu0 %v7538_v1 }
 0x192   :  { %4951 = vmatmul.mubr.msk.bf16.gmra.mrb[80].mxu0 %vm277_vm1, %v5825_v12  ;;  %v5863_v12 = vld [vmem:[%s7530_s3 + $0x104] ss:$8 sps:$4 sm:$0xff]  }
 0x193   :  { %2270 = vmatprep.mubr.bf16.mxu0 %v7538_v1  ;;  %3399 = vmatprep.subr.bf16.mxu1 %v5863_v12 }
 0x194   :  { %3400 = vmatpush1.bf16.msra.mxu1 %v5861_v2 }
 0x19a   :  { %4952 = vmatmul.mubr.msk.bf16.gmra.mrb[84].mxu0 %vm277_vm1, %v5827_v13  ;;  %v5845_v13 = vld [vmem:[%s7529_s0 + $0x60] sm:$0xff]  }
 0x19b   :  { %2280 = vmatprep.mubr.bf16.mxu0 %v7538_v1 }
 0x1a2   :  { %4953 = vmatmul.mubr.msk.bf16.gmra.mrb[88].mxu0 %vm277_vm1, %v5829_v14  ;;  %v6679_v17 = vpop.f32.mrb[20].mxu1 }
 0x1a3   :  { %2290 = vmatprep.mubr.bf16.mxu0 %v7538_v1  ;;  %v6681_v18 = vpop.f32.mrb[21].mxu1 }
 0x1a4   :  { %v6683_v19 = vpop.f32.mrb[22].mxu1 }
 0x1a5   :  { %v6688_v21 = vpop.f32.mrb[23].mxu1 }
 0x1aa   :  { %4954 = vmatmul.mubr.msk.bf16.gmra.mrb[92].mxu0 %vm277_vm1, %v5831_v15  ;;  %v6692_v22 = vpop.f32.mrb[24].mxu1  ;;  %v5866_v15 = vld [vmem:[%s7530_s3 + $0x114] ss:$8 sps:$4 sm:$0xff]  }
 0x1ab   :  { %2699 = vmatprep.mubr.bf16.mxu0 %v7538_v1  ;;  %v6694_v23 = vpop.f32.mrb[25].mxu1  ;;  %3401 = vmatprep.subr.bf16.mxu1 %v5866_v15 }
 0x1ac   :  { %v6696_v24 = vpop.f32.mrb[26].mxu1 }
 0x1ad   :  { %v6701_v26 = vpop.f32.mrb[27].mxu1 }
 0x1b2   :  { %5036 = vmatmul.mubr.msk.bf16.vlgmr.msra.gmra.mrb[0].mxu0 %vm277_vm1, %v5833_v16  ;;  %v6705_v27 = vpop.f32.mrb[28].mxu1 }
 0x1b3   :  { %2709 = vmatprep.mubr.bf16.mxu0 %v7538_v1  ;;  %v6707_v28 = vpop.f32.mrb[29].mxu1 }
 0x1b4   :  { %v6709_v29 = vpop.f32.mrb[30].mxu1 }
 0x1b5   :  { %v6714_v31 = vpop.f32.mrb[31].mxu1 }
 0x1ba   :  { %5037 = vmatmul.mubr.msk.bf16.gmra.mrb[4].mxu0 %vm277_vm1, %v5835_v20  ;;  %v6718_v32 = vpop.f32.mrb[32].mxu1  ;;  %v5864_v20 = vld [vmem:[%s7530_s3 + $0x110] ss:$8 sps:$4 sm:$0xff]  }
 0x1bb   :  { %2719 = vmatprep.mubr.bf16.mxu0 %v7538_v1  ;;  %v6720_v33 = vpop.f32.mrb[33].mxu1  ;;  %3402 = vmatpush1.bf16.msra.mxu1 %v5864_v20 }
 0x1bc   :  { %v6722_v34 = vpop.f32.mrb[34].mxu1 }
 0x1bd   :  { %v6727_v36 = vpop.f32.mrb[35].mxu1 }
 0x1c2   :  { %5038 = vmatmul.mubr.msk.bf16.gmra.mrb[8].mxu0 %vm277_vm1, %v5837_v25  ;;  %v6731_v37 = vpop.f32.mrb[36].mxu1  ;;  %v5869_v25 = vld [vmem:[%s7530_s3 + $0x124] ss:$8 sps:$4 sm:$0xff]  }
 0x1c3   :  { %2729 = vmatprep.mubr.bf16.mxu0 %v7538_v1  ;;  %v6733_v38 = vpop.f32.mrb[37].mxu1  ;;  %3403 = vmatprep.subr.bf16.mxu1 %v5869_v25 }
 0x1c4   :  { %v6735_v39 = vpop.f32.mrb[38].mxu1 }
 0x1c5   :  { %v6740_v41 = vpop.f32.mrb[39].mxu1 }
 0x1ca   :  { %5039 = vmatmul.mubr.msk.bf16.gmra.mrb[12].mxu0 %vm277_vm1, %v5839_v30  ;;  %v6744_v42 = vpop.f32.mrb[40].mxu1  ;;  %v5867_v30 = vld [vmem:[%s7530_s3 + $0x120] ss:$8 sps:$4 sm:$0xff]  }
 0x1cb   :  { %2739 = vmatprep.mubr.bf16.mxu0 %v7538_v1  ;;  %v6746_v43 = vpop.f32.mrb[41].mxu1  ;;  %3404 = vmatpush1.bf16.msra.mxu1 %v5867_v30 }
 0x1cc   :  { %v6748_v44 = vpop.f32.mrb[42].mxu1 }
 0x1cd   :  { %v6753_v46 = vpop.f32.mrb[43].mxu1 }
 0x1d2   :  { %5040 = vmatmul.mubr.msk.bf16.gmra.mrb[16].mxu0 %vm277_vm1, %v5841_v35  ;;  %v6757_v47 = vpop.f32.mrb[44].mxu1 }
 0x1d3   :  { %2749 = vmatprep.mubr.bf16.mxu0 %v7538_v1  ;;  %v6759_v48 = vpop.f32.mrb[45].mxu1 }
 0x1d4   :  { %v6761_v49 = vpop.f32.mrb[46].mxu1 }
 0x1d5   :  { %v6766_v55 = vpop.f32.mrb[47].mxu1 }
 0x1da   :  { %5041 = vmatmul.mubr.msk.bf16.gmra.mrb[20].mxu0 %vm277_vm1, %v5842_v40  ;;  %v6770_v60 = vpop.f32.mrb[48].mxu1  ;;  %v5846_v40 = vld [vmem:[%s7529_s0 + $0x68] sm:$0xff]  }
 0x1db   :  { %2759 = vmatprep.mubr.bf16.mxu0 %v7538_v1  ;;  %7541 = vst [vmem:[#allocation2_spill] sm:$0xff] %v6770_v60  ;;  %v6775_v7 = vpop.f32.mrb[49].mxu1 }
 0x1dc   :  { %7542 = vst [vmem:[#allocation3_spill] sm:$0xff] %v6775_v7  ;;  %v6783_v14 = vpop.f32.mrb[50].mxu1 }
 0x1dd   :  { %7543 = vst [vmem:[#allocation4_spill] sm:$0xff] %v6783_v14  ;;  %v6788_v16 = vpop.f32.mrb[51].mxu1 }
 0x1de   :  { %7544 = vst [vmem:[#allocation5_spill] sm:$0xff] %v6788_v16 }
 0x1e2   :  { %5042 = vmatmul.mubr.msk.bf16.gmra.mrb[24].mxu0 %vm277_vm1, %v5843_v45  ;;  %v6801_v35 = vpop.f32.mrb[52].mxu1 }
 0x1e3   :  { %2769 = vmatprep.mubr.bf16.mxu0 %v7538_v1  ;;  %7545 = vst [vmem:[#allocation6_spill] sm:$0xff] %v6801_v35  ;;  %v6806_v45 = vpop.f32.mrb[53].mxu1 }
 0x1e4   :  { %7546 = vst [vmem:[#allocation7_spill] sm:$0xff] %v6806_v45 }
 0x1ea   :  { %5043 = vmatmul.mubr.msk.bf16.gmra.mrb[28].mxu0 %vm277_vm1, %v5844_v52  ;;  %v6808_v52 = vpop.f32.mrb[54].mxu1 }
 0x1eb   :  { %2779 = vmatprep.mubr.bf16.mxu0 %v7538_v1  ;;  %7547 = vst [vmem:[#allocation8_spill] sm:$0xff] %v6808_v52  ;;  %v6810_v2 = vpop.f32.mrb[55].mxu1 }
 0x1ec   :  { %7548 = vst [vmem:[#allocation9_spill] sm:$0xff] %v6810_v2  ;;  %v6814_v12 = vpop.f32.mrb[56].mxu1 }
 0x1ed   :  { %7549 = vst [vmem:[#allocation10_spill] sm:$0xff] %v6814_v12  ;;  %v6819_v15 = vpop.f32.mrb[57].mxu1 }
 0x1ee   :  { %7550 = vst [vmem:[#allocation11_spill] sm:$0xff] %v6819_v15  ;;  %v6821_v20 = vpop.f32.mrb[58].mxu1 }
 0x1ef   :  { %7551 = vst [vmem:[#allocation12_spill] sm:$0xff] %v6821_v20  ;;  %v6823_v25 = vpop.f32.mrb[59].mxu1 }
 0x1f0   :  { %7552 = vst [vmem:[#allocation13_spill] sm:$0xff] %v6823_v25 }
 0x1f2   :  { %5044 = vmatmul.mubr.msk.bf16.gmra.mrb[32].mxu0 %vm277_vm1, %v5845_v13  ;;  %v5847_v13 = vld [vmem:[%s7529_s0 + $0x70] sm:$0xff]   ;;  %v6827_v30 = vpop.f32.mrb[60].mxu1 }
 0x1f3   :  { %2789 = vmatprep.mubr.bf16.mxu0 %v7538_v1  ;;  %7553 = vst [vmem:[#allocation14_spill] sm:$0xff] %v6827_v30  ;;  %v6832_v12 = vpop.f32.mrb[61].mxu1  ;;  %v5872_v30 = vld [vmem:[%s7530_s3 + $0x134] ss:$8 sps:$4 sm:$0xff]  }
 0x1f4   :  { %7554 = vst [vmem:[#allocation15_spill] sm:$0xff] %v6832_v12  ;;  %v6834_v2 = vpop.f32.mrb[62].mxu1  ;;  %3405 = vmatprep.subr.bf16.mxu1 %v5872_v30  ;;  %v5850_v30 = vld [vmem:[%s7529_s0 + $0x88] sm:$0xff]  }
 0x1f5   :  { %7555 = vst [vmem:[#allocation16_spill] sm:$0xff] %v6834_v2  ;;  %v6836_v52 = vpop.f32.mrb[63].mxu1 }
 0x1f6   :  { %7556 = vst [vmem:[#allocation17_spill] sm:$0xff] %v6836_v52 }
 0x1fa   :  { %5045 = vmatmul.mubr.msk.bf16.gmra.mrb[36].mxu0 %vm277_vm1, %v5846_v40  ;;  %v5848_v40 = vld [vmem:[%s7529_s0 + $0x78] sm:$0xff]   ;;  %v6840_v25 = vpop.f32.mrb[64].mxu1 }
 0x1fb   :  { %2799 = vmatprep.mubr.bf16.mxu0 %v7538_v1  ;;  %7557 = vst [vmem:[#allocation18_spill] sm:$0xff] %v6840_v25  ;;  %v6848_v20 = vpop.f32.mrb[65].mxu1  ;;  %v7561_v25 = vmov 0  }
 0x1fc   :  { %7558 = vst [vmem:[#allocation19_spill] sm:$0xff] %v6848_v20  ;;  %v6850_v12 = vpop.f32.mrb[66].mxu1 }
 0x1fd   :  { %7559 = vst [vmem:[#allocation20_spill] sm:$0xff] %v6850_v12 }
 0x202   :  { %5046 = vmatmul.mubr.msk.bf16.gmra.mrb[40].mxu0 %vm277_vm1, %v5847_v13  ;;  %v5870_v13 = vld [vmem:[%s7530_s3 + $0x130] ss:$8 sps:$4 sm:$0xff]  }
 0x203   :  { %2809 = vmatprep.mubr.bf16.mxu0 %v7538_v1  ;;  %3406 = vmatpush1.bf16.msra.mxu1 %v5870_v13 }
 0x20a   :  { %5047 = vmatmul.mubr.msk.bf16.gmra.mrb[44].mxu0 %vm277_vm1, %v5848_v40  ;;  %v5849_v40 = vld [vmem:[%s7529_s0 + $0x80] sm:$0xff]  }
 0x20b   :  { %2819 = vmatprep.mubr.bf16.mxu0 %v7538_v1  ;;  %v6855_v1 = vpop.f32.mrb[67].mxu1 }
 0x20c   :  { %7560 = vst [vmem:[#allocation21_spill] sm:$0xff] %v6855_v1  ;;  %v6859_v52 = vpop.f32.mrb[68].mxu1  ;;  %v5876_v1 = vld [vmem:[%s7530_s3 + $0x150] ss:$8 sps:$4 sm:$0xff]  }
 0x20d   :  { %7562 = vst [vmem:[#allocation22_spill] sm:$0xff] %v6859_v52  ;;  %v6861_v2 = vpop.f32.mrb[69].mxu1 }
 0x20e   :  { %7563 = vst [vmem:[#allocation23_spill] sm:$0xff] %v6861_v2  ;;  %v6863_v15 = vpop.f32.mrb[70].mxu1 }
 0x20f   :  { %7564 = vst [vmem:[#allocation24_spill] sm:$0xff] %v6863_v15  ;;  %v6868_v12 = vpop.f32.mrb[71].mxu1  ;;  %v5875_v15 = vld [vmem:[%s7530_s3 + $0x144] ss:$8 sps:$4 sm:$0xff]  }
 0x210   :  { %7565 = vst [vmem:[#allocation25_spill] sm:$0xff] %v6868_v12  ;;  %v6872_v13 = vpop.f32.mrb[72].mxu1  ;;  %3407 = vmatprep.subr.bf16.mxu1 %v5875_v15 }
 0x211   :  { %7566 = vst [vmem:[#allocation26_spill] sm:$0xff] %v6872_v13  ;;  %v6880_v2 = vpop.f32.mrb[73].mxu1  ;;  %v5878_v13 = vld [vmem:[%s7530_s3 + $0x154] ss:$8 sps:$4 sm:$0xff]  }
 0x212   :  { %5048 = vmatmul.mubr.msk.bf16.gmra.mrb[48].mxu0 %vm277_vm1, %v5849_v40  ;;  %v5873_v40 = vld [vmem:[%s7530_s3 + $0x140] ss:$8 sps:$4 sm:$0xff]   ;;  %7567 = vst [vmem:[#allocation27_spill] sm:$0xff] %v6880_v2  ;;  %v6882_v52 = vpop.f32.mrb[74].mxu1 }
 0x213   :  { %2829 = vmatprep.mubr.bf16.mxu0 %v7561_v25  ;;  %7568 = vst [vmem:[#allocation28_spill] sm:$0xff] %v6882_v52  ;;  %v6887_v12 = vpop.f32.mrb[75].mxu1  ;;  %3408 = vmatpush1.bf16.msra.mxu1 %v5873_v40  ;;  %v5881_v40 = vld [vmem:[%s7530_s3 + $0x164] ss:$8 sps:$4 sm:$0xff]   ;;  %v5879_v2 = vld [vmem:[%s7530_s3 + $0x160] ss:$8 sps:$4 sm:$0xff]  }
 0x214   :  { %7569 = vst [vmem:[#allocation29_spill] sm:$0xff] %v6887_v12  ;;  %3409 = vmatprep.subr.bf16.mxu1 %v5878_v13  ;;  %v6897_v15 = vpop.f32.mrb[76].mxu1  ;;  %v5852_v13 = vld [vmem:[%s7529_s0 + $0x98] sm:$0xff]  }
 0x215   :  { %7570 = vst [vmem:[#allocation30_spill] sm:$0xff] %v6897_v15  ;;  %v6899_v52 = vpop.f32.mrb[77].mxu1 }
 0x216   :  { %7571 = vst [vmem:[#allocation31_spill] sm:$0xff] %v6899_v52  ;;  %v6904_v12 = vpop.f32.mrb[78].mxu1 }
 0x217   :  { %3410 = vmatpush1.bf16.msra.mxu1 %v5876_v1  ;;  %7572 = vst [vmem:[#allocation32_spill] sm:$0xff] %v6904_v12  ;;  %v5884_v1 = vld [vmem:[%s7530_s3 + $0x174] ss:$8 sps:$4 sm:$0xff]   ;;  %v5882_v12 = vld [vmem:[%s7530_s3 + $0x170] ss:$8 sps:$4 sm:$0xff]  }
 0x218   :  { %3411 = vmatprep.subr.bf16.mxu1 %v5881_v40 }
 0x21a   :  { %5049 = vmatmul.mubr.msk.bf16.gmra.mrb[52].mxu0 %vm277_vm1, %v5850_v30  ;;  %v5851_v30 = vld [vmem:[%s7529_s0 + $0x90] sm:$0xff]  }
 0x21b   :  { %2839 = vmatprep.mubr.bf16.mxu0 %v7561_v25  ;;  %3412 = vmatpush1.bf16.msra.mxu1 %v5879_v2  ;;  %v5887_v2 = vld [vmem:[%s7530_s3 + $0x184] ss:$8 sps:$4 sm:$0xff]  }
 0x21c   :  { %3413 = vmatprep.subr.bf16.mxu1 %v5884_v1 }
 0x21f   :  { %3414 = vmatpush1.bf16.msra.mxu1 %v5882_v12  ;;  %v5890_v12 = vld [vmem:[%s7530_s3 + $0x194] ss:$8 sps:$4 sm:$0xff]  }
 0x220   :  { %3415 = vmatprep.subr.bf16.mxu1 %v5887_v2 }
 0x222   :  { %5050 = vmatmul.mubr.msk.bf16.gmra.mrb[56].mxu0 %vm277_vm1, %v5851_v30  ;;  %v6912_v30 = vpop.f32.mrb[79].mxu1 }
 0x223   :  { %2849 = vmatprep.mubr.bf16.mxu0 %v7561_v25  ;;  %7573 = vst [vmem:[#allocation33_spill] sm:$0xff] %v6912_v30  ;;  %v6922_v52 = vpop.f32.mrb[80].mxu1  ;;  %v5885_v30 = vld [vmem:[%s7530_s3 + $0x180] ss:$8 sps:$4 sm:$0xff]  }
 0x224   :  { %7574 = vst [vmem:[#allocation34_spill] sm:$0xff] %v6922_v52  ;;  %v6924_v15 = vpop.f32.mrb[81].mxu1  ;;  %3416 = vmatpush1.bf16.msra.mxu1 %v5885_v30  ;;  %v5893_v30 = vld [vmem:[%s7530_s3 + $0x1a4] ss:$8 sps:$4 sm:$0xff]  }
 0x225   :  { %7575 = vst [vmem:[#allocation35_spill] sm:$0xff] %v6924_v15  ;;  %v6929_v40 = vpop.f32.mrb[82].mxu1  ;;  %3417 = vmatprep.subr.bf16.mxu1 %v5890_v12 }
 0x226   :  { %7576 = vst [vmem:[#allocation36_spill] sm:$0xff] %v6929_v40  ;;  %v6937_v1 = vpop.f32.mrb[83].mxu1  ;;  %v5888_v40 = vld [vmem:[%s7530_s3 + $0x190] ss:$8 sps:$4 sm:$0xff]  }
 0x227   :  { %7577 = vst [vmem:[#allocation37_spill] sm:$0xff] %v6937_v1  ;;  %v6947_v15 = vpop.f32.mrb[84].mxu1  ;;  %v5891_v1 = vld [vmem:[%s7530_s3 + $0x1a0] ss:$8 sps:$4 sm:$0xff]  }
 0x228   :  { %7578 = vst [vmem:[#allocation38_spill] sm:$0xff] %v6947_v15  ;;  %3418 = vmatpush1.bf16.msra.mxu1 %v5888_v40  ;;  %v6949_v52 = vpop.f32.mrb[85].mxu1  ;;  %v5896_v40 = vld [vmem:[%s7530_s3 + $0x1b4] ss:$8 sps:$4 sm:$0xff]  }
 0x229   :  { %7579 = vst [vmem:[#allocation39_spill] sm:$0xff] %v6949_v52  ;;  %v6954_v2 = vpop.f32.mrb[86].mxu1  ;;  %3419 = vmatprep.subr.bf16.mxu1 %v5893_v30 }
 0x22a   :  { %5051 = vmatmul.mubr.msk.bf16.gmra.mrb[60].mxu0 %vm277_vm1, %v5852_v13  ;;  %v5853_v13 = vld [vmem:[%s7529_s0 + $0xa0] sm:$0xff]   ;;  %7580 = vst [vmem:[#allocation40_spill] sm:$0xff] %v6954_v2  ;;  %v6962_v12 = vpop.f32.mrb[87].mxu1  ;;  %v5894_v2 = vld [vmem:[%s7530_s3 + $0x1b0] ss:$8 sps:$4 sm:$0xff]  }
 0x22b   :  { %2859 = vmatprep.mubr.bf16.mxu0 %v7561_v25  ;;  %7581 = vst [vmem:[#allocation41_spill] sm:$0xff] %v6962_v12  ;;  %v6972_v52 = vpop.f32.mrb[88].mxu1  ;;  %v5897_v12 = vld [vmem:[%s7530_s3 + $0x1c0] ss:$8 sps:$4 sm:$0xff]  }
 0x22c   :  { %3420 = vmatpush1.bf16.msra.mxu1 %v5891_v1  ;;  %7582 = vst [vmem:[#allocation42_spill] sm:$0xff] %v6972_v52  ;;  %v6974_v15 = vpop.f32.mrb[89].mxu1  ;;  %v5899_v1 = vld [vmem:[%s7530_s3 + $0x1c4] ss:$8 sps:$4 sm:$0xff]  }
 0x22d   :  { %3421 = vmatprep.subr.bf16.mxu1 %v5896_v40  ;;  %7583 = vst [vmem:[#allocation43_spill] sm:$0xff] %v6974_v15  ;;  %v6979_v30 = vpop.f32.mrb[90].mxu1 }
 0x22e   :  { %7584 = vst [vmem:[#allocation44_spill] sm:$0xff] %v6979_v30  ;;  %v6987_v40 = vpop.f32.mrb[91].mxu1  ;;  %v5900_v30 = vld [vmem:[%s7530_s3 + $0x1d0] ss:$8 sps:$4 sm:$0xff]  }
 0x22f   :  { %7585 = vst [vmem:[#allocation45_spill] sm:$0xff] %v6987_v40  ;;  %v5903_v40 = vld [vmem:[%s7530_s3 + $0x1e0] ss:$8 sps:$4 sm:$0xff]  }
 0x230   :  { %3422 = vmatpush1.bf16.msra.mxu1 %v5894_v2  ;;  %v5902_v2 = vld [vmem:[%s7530_s3 + $0x1d4] ss:$8 sps:$4 sm:$0xff]  }
 0x231   :  { %3423 = vmatprep.subr.bf16.mxu1 %v5899_v1 }
 0x232   :  { %5052 = vmatmul.mubr.msk.bf16.gmra.mrb[64].mxu0 %vm277_vm1, %v5853_v13  ;;  %v5854_v13 = vld [vmem:[%s7529_s0 + $0xa8] sm:$0xff]   ;;  %v6997_v15 = vpop.f32.mrb[92].mxu1 }
 0x233   :  { %2869 = vmatprep.mubr.bf16.mxu0 %v7561_v25  ;;  %7586 = vst [vmem:[#allocation46_spill] sm:$0xff] %v6997_v15  ;;  %v6999_v52 = vpop.f32.mrb[93].mxu1 }
 0x234   :  { %3424 = vmatpush1.bf16.msra.mxu1 %v5897_v12  ;;  %7587 = vst [vmem:[#allocation47_spill] sm:$0xff] %v6999_v52  ;;  %v5905_v12 = vld [vmem:[%s7530_s3 + $0x1e4] ss:$8 sps:$4 sm:$0xff]   ;;  %v7004_v1 = vpop.f32.mrb[94].mxu1 }
 0x235   :  { %3425 = vmatprep.subr.bf16.mxu1 %v5902_v2  ;;  %7588 = vst [vmem:[#allocation48_spill] sm:$0xff] %v7004_v1  ;;  %v7012_v2 = vpop.f32.mrb[95].mxu1  ;;  %v5906_v1 = vld [vmem:[%s7530_s3 + $0x1f0] ss:$8 sps:$4 sm:$0xff]  }
 0x236   :  { %7589 = vst [vmem:[#allocation49_spill] sm:$0xff] %v7012_v2  ;;  %v5857_v2 = vld [vmem:[%s7529_s0 + $0xc0] sm:$0xff]  }
 0x238   :  { %3426 = vmatpush1.bf16.msra.mxu1 %v5900_v30  ;;  %v5908_v30 = vld [vmem:[%s7530_s3 + $0x1f4] ss:$8 sps:$4 sm:$0xff]  }
 0x239   :  { %3427 = vmatprep.subr.bf16.mxu1 %v5905_v12  ;;  %v5859_v12 = vld [vmem:[%s7529_s0 + $0xd0] sm:$0xff]  }
 0x23a   :  { %5053 = vmatmul.mubr.msk.bf16.gmra.mrb[68].mxu0 %vm277_vm1, %v5854_v13  ;;  %v5855_v13 = vld [vmem:[%s7529_s0 + $0xb0] sm:$0xff]  }
 0x23b   :  { %2879 = vmatprep.mubr.bf16.mxu0 %v7561_v25 }
 0x23c   :  { %3428 = vmatpush1.bf16.msra.mxu1 %v5903_v40  ;;  %v5858_v40 = vld [vmem:[%s7529_s0 + $0xc8] sm:$0xff]  }
 0x23d   :  { %3429 = vmatprep.subr.bf16.mxu1 %v5908_v30 }
 0x240   :  { %3430 = vmatpush1.bf16.msra.mxu1 %v5906_v1  ;;  %v5860_v1 = vld [vmem:[%s7529_s0 + $0xd8] sm:$0xff]  }
 0x242   :  { %5054 = vmatmul.mubr.msk.bf16.gmra.mrb[72].mxu0 %vm277_vm1, %v5855_v13  ;;  %v5856_v13 = vld [vmem:[%s7529_s0 + $0xb8] sm:$0xff]  }
 0x243   :  { %2889 = vmatprep.mubr.bf16.mxu0 %v7561_v25 }
 0x24a   :  { %5055 = vmatmul.mubr.msk.bf16.gmra.mrb[76].mxu0 %vm277_vm1, %v5856_v13  ;;  %v5911_v13 = vld [vmem:[%s7530_s3 + $0x4] ss:$8 sps:$4 sm:$0xff]  }
 0x24b   :  { %2899 = vmatprep.mubr.bf16.mxu0 %v7561_v25  ;;  %3672 = vmatprep.subr.bf16.mxu1 %v5911_v13 }
 0x252   :  { %5056 = vmatmul.mubr.msk.bf16.gmra.mrb[80].mxu0 %vm277_vm1, %v5857_v2 }
 0x253   :  { %2909 = vmatprep.mubr.bf16.mxu0 %v7561_v25 }
 0x25a   :  { %5057 = vmatmul.mubr.msk.bf16.gmra.mrb[84].mxu0 %vm277_vm1, %v5858_v40 }
 0x25b   :  { %2919 = vmatprep.mubr.bf16.mxu0 %v7561_v25 }
 0x262   :  { %5058 = vmatmul.mubr.msk.bf16.gmra.mrb[88].mxu0 %vm277_vm1, %v5859_v12 }
 0x263   :  { %2929 = vmatprep.mubr.bf16.mxu0 %v7561_v25 }
 0x26a   :  { %5059 = vmatmul.mubr.msk.bf16.gmra.mrb[92].mxu0 %vm277_vm1, %v5860_v1 }
 0x285   :  { %v2701_v2 = vpop.f32.mrb[0].mxu0 }
 0x286   :  { %v5260_v30 = vadd.f32 %v2701_v2, %v6589_v50  ;;  %v2703_v40 = vpop.f32.mrb[1].mxu0 }
 0x287   :  { %v5261_v52 = vadd.f32 %v2703_v40, %v6592_v51  ;;  %v2705_v12 = vpop.f32.mrb[2].mxu0 }
 0x288   :  { %v5262_v25 = vadd.f32 %v2705_v12, %v6597_v53  ;;  %v2707_v15 = vpop.f32.mrb[3].mxu0  ;;  %v7055_v53 = vld [vmem:[%s7531_s2] ss:$0 sm:$0xff] }
 0x289   :  { %v3036_v20 = vmax.f32 %v5260_v30, %v5261_v52  ;;  %v5263_v45 = vadd.f32 %v2707_v15, %v6599_v54 }
 0x28b   :  { %v3037_v35 = vmax.f32 %v5262_v25, %v5263_v45 }
 0x28d   :  { %v2711_v1 = vpop.f32.mrb[4].mxu0 }
 0x28e   :  { %v5264_v16 = vadd.f32 %v2711_v1, %v6606_v56  ;;  %v2713_v14 = vpop.f32.mrb[5].mxu0 }
 0x28f   :  { %v5265_v7 = vadd.f32 %v2713_v14, %v6609_v57  ;;  %v2715_v60 = vpop.f32.mrb[6].mxu0 }
 0x290   :  { %v5266_v50 = vadd.f32 %v2715_v60, %v6611_v58  ;;  %v2717_v13 = vpop.f32.mrb[7].mxu0 }
 0x291   :  { %v3038_v2 = vmax.f32 %v5264_v16, %v5265_v7  ;;  %v5267_v51 = vadd.f32 %v2717_v13, %v6613_v59 }
 0x293   :  { %v3084_v54 = vmax.f32 %v3036_v20, %v3038_v2  ;;  %v3039_v45 = vmax.f32 %v5266_v50, %v5267_v51 }
 0x295   :  { %v3115_v52 = vadd.f32 %v7055_v53, %v3084_v54  ;;  %v3085_v56 = vmax.f32 %v3037_v35, %v3039_v45  ;;  %v2721_v25 = vpop.f32.mrb[8].mxu0 }
 0x296   :  { %v5268_v57 = vadd.f32 %v2721_v25, %v6619_v61  ;;  %v2723_v14 = vpop.f32.mrb[9].mxu0 }
 0x297   :  { %v3116_v58 = vadd.f32 %v7055_v53, %v3085_v56  ;;  %v5269_v60 = vadd.f32 %v2723_v14, %v6622_v62  ;;  %v2725_v7 = vpop.f32.mrb[10].mxu0  ;;  %v3139_v15 = vmax.f32 %v3115_v52, 0.0 }
 0x298   :  { %v5270_v59 = vadd.f32 %v2725_v7, %v6624_v63  ;;  %v2727_v16 = vpop.f32.mrb[11].mxu0 }
 0x299   :  { %v3140_v30 = vmax.f32 %v3116_v58, 0.0  ;;  %v3040_v40 = vmax.f32 %v5268_v57, %v5269_v60  ;;  %v5271_v20 = vadd.f32 %v2727_v16, %v6626_v0 }
 0x29b   :  { %v7063_v12 = vpack.c.bf16 %v3140_v30, %v3139_v15  ;;  %v3041_v35 = vmax.f32 %v5270_v59, %v5271_v20 }
 0x29d   :  { %v2731_v1 = vpop.f32.mrb[12].mxu0 }
 0x29e   :  { %v5272_v61 = vadd.f32 %v2731_v1, %v6632_v3  ;;  %v2733_v50 = vpop.f32.mrb[13].mxu0 }
 0x29f   :  { %v5273_v13 = vadd.f32 %v2733_v50, %v6635_v4  ;;  %v2735_v2 = vpop.f32.mrb[14].mxu0 }
 0x2a0   :  { %v5274_v62 = vadd.f32 %v2735_v2, %v6637_v5  ;;  %v2737_v51 = vpop.f32.mrb[15].mxu0 }
 0x2a1   :  { %v3042_v63 = vmax.f32 %v5272_v61, %v5273_v13  ;;  %v5275_v54 = vadd.f32 %v2737_v51, %v6639_v6 }
 0x2a3   :  { %v3086_v45 = vmax.f32 %v3040_v40, %v3042_v63  ;;  %v3043_v52 = vmax.f32 %v5274_v62, %v5275_v54 }
 0x2a5   :  { %v3087_v56 = vmax.f32 %v3041_v35, %v3043_v52  ;;  %v2741_v0 = vpop.f32.mrb[16].mxu0  ;;  %v3117_v25 = vadd.f32 %v7055_v53, %v3086_v45 }
 0x2a6   :  { %v5276_v57 = vadd.f32 %v2741_v0, %v6645_v8  ;;  %v2743_v14 = vpop.f32.mrb[17].mxu0 }
 0x2a7   :  { %v5277_v3 = vadd.f32 %v2743_v14, %v6648_v9  ;;  %v2745_v58 = vpop.f32.mrb[18].mxu0  ;;  %v3118_v4 = vadd.f32 %v7055_v53, %v3087_v56  ;;  %v3141_v59 = vmax.f32 %v3117_v25, 0.0 }
 0x2a8   :  { %v5278_v5 = vadd.f32 %v2745_v58, %v6650_v10  ;;  %v2747_v60 = vpop.f32.mrb[19].mxu0 }
 0x2a9   :  { %v3044_v7 = vmax.f32 %v5276_v57, %v5277_v3  ;;  %v5279_v6 = vadd.f32 %v2747_v60, %v6652_v11  ;;  %v3142_v16 = vmax.f32 %v3118_v4, 0.0 }
 0x2ab   :  { %v3045_v15 = vmax.f32 %v5278_v5, %v5279_v6  ;;  %v7075_v30 = vpack.c.bf16 %v3142_v16, %v3141_v59 }
 0x2ad   :  { %v2751_v40 = vpop.f32.mrb[20].mxu0 }
 0x2ae   :  { %v5280_v8 = vadd.f32 %v2751_v40, %v6679_v17  ;;  %v2753_v20 = vpop.f32.mrb[21].mxu0 }
 0x2af   :  { %v5281_v9 = vadd.f32 %v2753_v20, %v6681_v18  ;;  %v2755_v35 = vpop.f32.mrb[22].mxu0 }
 0x2b0   :  { %v5282_v1 = vadd.f32 %v2755_v35, %v6683_v19  ;;  %v2757_v61 = vpop.f32.mrb[23].mxu0 }
 0x2b1   :  { %v3046_v10 = vmax.f32 %v5280_v8, %v5281_v9  ;;  %v5283_v50 = vadd.f32 %v2757_v61, %v6688_v21 }
 0x2b3   :  { %v3088_v13 = vmax.f32 %v3044_v7, %v3046_v10  ;;  %v3047_v11 = vmax.f32 %v5282_v1, %v5283_v50 }
 0x2b5   :  { %v3119_v2 = vadd.f32 %v7055_v53, %v3088_v13  ;;  %v3089_v62 = vmax.f32 %v3045_v15, %v3047_v11  ;;  %v2761_v51 = vpop.f32.mrb[24].mxu0 }
 0x2b6   :  { %v5284_v63 = vadd.f32 %v2761_v51, %v6692_v22  ;;  %v2763_v54 = vpop.f32.mrb[25].mxu0 }
 0x2b7   :  { %v3120_v17 = vadd.f32 %v7055_v53, %v3089_v62  ;;  %v5285_v18 = vadd.f32 %v2763_v54, %v6694_v23  ;;  %v2765_v45 = vpop.f32.mrb[26].mxu0  ;;  %v3143_v56 = vmax.f32 %v3119_v2, 0.0  ;;  %v5912_v62 = vld [vmem:[%s7530_s3 + $0x10] ss:$8 sps:$4 sm:$0xff]   ;;  %v5917_v54 = vld [vmem:[%s7530_s3 + $0x24] ss:$8 sps:$4 sm:$0xff]  }
 0x2b8   :  { %v5286_v19 = vadd.f32 %v2765_v45, %v6696_v24  ;;  %v2767_v52 = vpop.f32.mrb[27].mxu0 }
 0x2b9   :  { %v3144_v0 = vmax.f32 %v3120_v17, 0.0  ;;  %v3048_v21 = vmax.f32 %v5284_v63, %v5285_v18  ;;  %v5287_v25 = vadd.f32 %v2767_v52, %v6701_v26 }
 0x2bb   :  { %v7087_v57 = vpack.c.bf16 %v3144_v0, %v3143_v56  ;;  %v3049_v14 = vmax.f32 %v5286_v19, %v5287_v25 }
 0x2bd   :  { %v2771_v3 = vpop.f32.mrb[28].mxu0 }
 0x2be   :  { %v5288_v22 = vadd.f32 %v2771_v3, %v6705_v27  ;;  %v2773_v58 = vpop.f32.mrb[29].mxu0  ;;  %v5918_v3 = vld [vmem:[%s7530_s3 + $0x30] ss:$8 sps:$4 sm:$0xff]  }
 0x2bf   :  { %v5289_v4 = vadd.f32 %v2773_v58, %v6707_v28  ;;  %v2775_v5 = vpop.f32.mrb[30].mxu0 }
 0x2c0   :  { %v5290_v23 = vadd.f32 %v2775_v5, %v6709_v29  ;;  %v2777_v60 = vpop.f32.mrb[31].mxu0 }
 0x2c1   :  { %v3050_v24 = vmax.f32 %v5288_v22, %v5289_v4  ;;  %v5291_v7 = vadd.f32 %v2777_v60, %v6714_v31  ;;  %v5923_v4 = vld [vmem:[%s7530_s3 + $0x44] ss:$8 sps:$4 sm:$0xff]  }
 0x2c3   :  { %v3090_v6 = vmax.f32 %v3048_v21, %v3050_v24  ;;  %v3051_v59 = vmax.f32 %v5290_v23, %v5291_v7  ;;  %v5921_v7 = vld [vmem:[%s7530_s3 + $0x40] ss:$8 sps:$4 sm:$0xff]  }
 0x2c5   :  { %v3121_v26 = vadd.f32 %v7055_v53, %v3090_v6  ;;  %v3091_v16 = vmax.f32 %v3049_v14, %v3051_v59  ;;  %v2781_v15 = vpop.f32.mrb[32].mxu0 }
 0x2c6   :  { %v5292_v40 = vadd.f32 %v2781_v15, %v6718_v32  ;;  %v2783_v8 = vpop.f32.mrb[33].mxu0  ;;  %v5909_v32 = vld [vmem:[%s7530_s3] ss:$8 sps:$4 sm:$0xff]   ;;  %v5924_v15 = vld [vmem:[%s7530_s3 + $0x50] ss:$8 sps:$4 sm:$0xff]  }
 0x2c7   :  { %v3122_v27 = vadd.f32 %v7055_v53, %v3091_v16  ;;  %v5293_v28 = vadd.f32 %v2783_v8, %v6720_v33  ;;  %v2785_v20 = vpop.f32.mrb[34].mxu0  ;;  %v3145_v35 = vmax.f32 %v3121_v26, 0.0  ;;  %v5914_v33 = vld [vmem:[%s7530_s3 + $0x14] ss:$8 sps:$4 sm:$0xff]  }
 0x2c8   :  { %v5294_v29 = vadd.f32 %v2785_v20, %v6722_v34  ;;  %v2787_v9 = vpop.f32.mrb[35].mxu0 }
 0x2c9   :  { %v3146_v1 = vmax.f32 %v3122_v27, 0.0  ;;  %v3052_v31 = vmax.f32 %v5292_v40, %v5293_v28  ;;  %v5295_v61 = vadd.f32 %v2787_v9, %v6727_v36  ;;  %v5929_v27 = vld [vmem:[%s7530_s3 + $0x64] ss:$8 sps:$4 sm:$0xff]  }
 0x2cb   :  { %v3053_v10 = vmax.f32 %v5294_v29, %v5295_v61  ;;  %v7099_v50 = vpack.c.bf16 %v3146_v1, %v3145_v35 }
 0x2cd   :  { %v2791_v13 = vpop.f32.mrb[36].mxu0  ;;  %3431 = vmatprep.mubr.bf16.mxu1 %v7099_v50 }
 0x2ce   :  { %v5296_v34 = vadd.f32 %v2791_v13, %v6731_v37  ;;  %v2793_v11 = vpop.f32.mrb[37].mxu0  ;;  %3432 = vmatmul.mubr.bf16.vlgmr.msra.gmra.mrb[96].mxu1 %v7087_v57 }
 0x2cf   :  { %v5297_v36 = vadd.f32 %v2793_v11, %v6733_v38  ;;  %v2795_v2 = vpop.f32.mrb[38].mxu0  ;;  %3673 = vmatpush1.bf16.msra.mxu1 %v5909_v32  ;;  %v5915_v38 = vld [vmem:[%s7530_s3 + $0x20] ss:$8 sps:$4 sm:$0xff]   ;;  %v7592_v11 = vld [vmem:[#allocation4_spill] sm:$0xff] }
 0x2d0   :  { %v5298_v51 = vadd.f32 %v2795_v2, %v6735_v39  ;;  %v2797_v63 = vpop.f32.mrb[39].mxu0  ;;  %3674 = vmatprep.subr.bf16.mxu1 %v5914_v33  ;;  %v5920_v39 = vld [vmem:[%s7530_s3 + $0x34] ss:$8 sps:$4 sm:$0xff]   ;;  %v7591_v32 = vld [vmem:[#allocation3_spill] sm:$0xff] }
 0x2d1   :  { %v3054_v37 = vmax.f32 %v5296_v34, %v5297_v36  ;;  %v5299_v17 = vadd.f32 %v2797_v63, %v6740_v41  ;;  %v5930_v34 = vld [vmem:[%s7530_s3 + $0x70] ss:$8 sps:$4 sm:$0xff]  }
 0x2d3   :  { %v3092_v18 = vmax.f32 %v3052_v31, %v3054_v37  ;;  %v3055_v45 = vmax.f32 %v5298_v51, %v5299_v17  ;;  %3675 = vmatpush1.bf16.msra.mxu1 %v5912_v62  ;;  %v7590_v31 = vld [vmem:[#allocation2_spill] sm:$0xff]  ;;  %v7593_v37 = vld [vmem:[#allocation5_spill] sm:$0xff] }
 0x2d4   :  { %3676 = vmatprep.subr.bf16.mxu1 %v5917_v54  ;;  %v5935_v62 = vld [vmem:[%s7530_s3 + $0x84] ss:$8 sps:$4 sm:$0xff]  }
 0x2d5   :  { %v3123_v19 = vadd.f32 %v7055_v53, %v3092_v18  ;;  %v3093_v52 = vmax.f32 %v3053_v10, %v3055_v45  ;;  %v2801_v56 = vpop.f32.mrb[40].mxu0 }
 0x2d6   :  { %v5300_v0 = vadd.f32 %v2801_v56, %v6744_v42  ;;  %v2803_v21 = vpop.f32.mrb[41].mxu0 }
 0x2d7   :  { %v3124_v41 = vadd.f32 %v7055_v53, %v3093_v52  ;;  %v5301_v25 = vadd.f32 %v2803_v21, %v6746_v43  ;;  %v2805_v14 = vpop.f32.mrb[42].mxu0  ;;  %3677 = vmatpush1.bf16.msra.mxu1 %v5915_v38  ;;  %v3147_v42 = vmax.f32 %v3123_v19, 0.0  ;;  %v5933_v38 = vld [vmem:[%s7530_s3 + $0x80] ss:$8 sps:$4 sm:$0xff]  }
 0x2d8   :  { %v5302_v22 = vadd.f32 %v2805_v14, %v6748_v44  ;;  %v2807_v58 = vpop.f32.mrb[43].mxu0  ;;  %3678 = vmatprep.subr.bf16.mxu1 %v5920_v39  ;;  %v5926_v44 = vld [vmem:[%s7530_s3 + $0x54] ss:$8 sps:$4 sm:$0xff]   ;;  %v7594_v52 = vld [vmem:[#allocation6_spill] sm:$0xff]  ;;  %v7595_v21 = vld [vmem:[#allocation7_spill] sm:$0xff] }
 0x2d9   :  { %v3148_v5 = vmax.f32 %v3124_v41, 0.0  ;;  %v3056_v23 = vmax.f32 %v5300_v0, %v5301_v25  ;;  %v5303_v60 = vadd.f32 %v2807_v58, %v6753_v46  ;;  %v5938_v39 = vld [vmem:[%s7530_s3 + $0x94] ss:$8 sps:$4 sm:$0xff]   ;;  %v5936_v14 = vld [vmem:[%s7530_s3 + $0x90] ss:$8 sps:$4 sm:$0xff]  }
 0x2db   :  { %v7137_v43 = vpack.c.bf16 %v3148_v5, %v3147_v42  ;;  %v3057_v24 = vmax.f32 %v5302_v22, %v5303_v60  ;;  %3679 = vmatpush1.bf16.msra.mxu1 %v5918_v3  ;;  %v7596_v3 = vld [vmem:[#allocation8_spill] sm:$0xff]  ;;  %v7597_v5 = vld [vmem:[#allocation9_spill] sm:$0xff] }
 0x2dc   :  { %3680 = vmatprep.subr.bf16.mxu1 %v5923_v4  ;;  %v5941_v4 = vld [vmem:[%s7530_s3 + $0xa4] ss:$8 sps:$4 sm:$0xff]  }
 0x2dd   :  { %v2811_v6 = vpop.f32.mrb[44].mxu0  ;;  %3441 = vmatprep.mubr.bf16.mxu1 %v7137_v43 }
 0x2de   :  { %v5304_v59 = vadd.f32 %v2811_v6, %v6757_v47  ;;  %v2813_v26 = vpop.f32.mrb[45].mxu0  ;;  %3442 = vmatmul.mubr.bf16.gmra.mrb[100].mxu1 %v7099_v50 }
 0x2df   :  { %v5305_v46 = vadd.f32 %v2813_v26, %v6759_v48  ;;  %v2815_v16 = vpop.f32.mrb[46].mxu0  ;;  %3681 = vmatpush1.bf16.msra.mxu1 %v5921_v7  ;;  %v5927_v48 = vld [vmem:[%s7530_s3 + $0x60] ss:$8 sps:$4 sm:$0xff]  }
 0x2e0   :  { %v5306_v40 = vadd.f32 %v2815_v16, %v6761_v49  ;;  %v2817_v8 = vpop.f32.mrb[47].mxu0  ;;  %3682 = vmatprep.subr.bf16.mxu1 %v5926_v44  ;;  %v5932_v49 = vld [vmem:[%s7530_s3 + $0x74] ss:$8 sps:$4 sm:$0xff]   ;;  %v5939_v7 = vld [vmem:[%s7530_s3 + $0xa0] ss:$8 sps:$4 sm:$0xff]  }
 0x2e1   :  { %v3058_v47 = vmax.f32 %v5304_v59, %v5305_v46  ;;  %v5307_v28 = vadd.f32 %v2817_v8, %v6766_v55  ;;  %v5944_v44 = vld [vmem:[%s7530_s3 + $0xb4] ss:$8 sps:$4 sm:$0xff]   ;;  %v7598_v46 = vld [vmem:[#allocation10_spill] sm:$0xff]  ;;  %v7599_v8 = vld [vmem:[#allocation11_spill] sm:$0xff] }
 0x2e3   :  { %v3094_v20 = vmax.f32 %v3056_v23, %v3058_v47  ;;  %v3059_v29 = vmax.f32 %v5306_v40, %v5307_v28  ;;  %3683 = vmatpush1.bf16.msra.mxu1 %v5924_v15  ;;  %v5942_v28 = vld [vmem:[%s7530_s3 + $0xb0] ss:$8 sps:$4 sm:$0xff]  }
 0x2e4   :  { %3684 = vmatprep.subr.bf16.mxu1 %v5929_v27 }
 0x2e5   :  { %v3125_v9 = vadd.f32 %v7055_v53, %v3094_v20  ;;  %v3095_v35 = vmax.f32 %v3057_v24, %v3059_v29  ;;  %v2821_v1 = vpop.f32.mrb[48].mxu0  ;;  %v7600_v20 = vld [vmem:[#allocation12_spill] sm:$0xff] }
 0x2e6   :  { %v5308_v61 = vadd.f32 %v2821_v1, %v7590_v31  ;;  %v2823_v10 = vpop.f32.mrb[49].mxu0  ;;  %v7601_v31 = vld [vmem:[#allocation13_spill] sm:$0xff] }
 0x2e7   :  { %v3126_v55 = vadd.f32 %v7055_v53, %v3095_v35  ;;  %v5309_v33 = vadd.f32 %v2823_v10, %v7591_v32  ;;  %v2825_v13 = vpop.f32.mrb[50].mxu0  ;;  %3685 = vmatpush1.bf16.msra.mxu1 %v5927_v48  ;;  %v3149_v51 = vmax.f32 %v3125_v9, 0.0  ;;  %v5945_v32 = vld [vmem:[%s7530_s3 + $0xc0] ss:$8 sps:$4 sm:$0xff]  }
 0x2e8   :  { %v5310_v36 = vadd.f32 %v2825_v13, %v7592_v11  ;;  %v2827_v2 = vpop.f32.mrb[51].mxu0  ;;  %3686 = vmatprep.subr.bf16.mxu1 %v5932_v49  ;;  %v5947_v49 = vld [vmem:[%s7530_s3 + $0xc4] ss:$8 sps:$4 sm:$0xff]  }
 0x2e9   :  { %v3150_v63 = vmax.f32 %v3126_v55, 0.0  ;;  %v3060_v54 = vmax.f32 %v5308_v61, %v5309_v33  ;;  %v5311_v17 = vadd.f32 %v2827_v2, %v7593_v37  ;;  %v5950_v33 = vld [vmem:[%s7530_s3 + $0xd4] ss:$8 sps:$4 sm:$0xff]   ;;  %v7603_v2 = vld [vmem:[#allocation15_spill] sm:$0xff] }
 0x2eb   :  { %v7175_v18 = vpack.c.bf16 %v3150_v63, %v3149_v51  ;;  %v3061_v45 = vmax.f32 %v5310_v36, %v5311_v17  ;;  %3687 = vmatpush1.bf16.msra.mxu1 %v5930_v34  ;;  %v7602_v34 = vld [vmem:[#allocation14_spill] sm:$0xff]  ;;  %v5948_v63 = vld [vmem:[%s7530_s3 + $0xd0] ss:$8 sps:$4 sm:$0xff]  }
 0x2ec   :  { %3688 = vmatprep.subr.bf16.mxu1 %v5935_v62 }
 0x2ed   :  { %v2831_v19 = vpop.f32.mrb[52].mxu0  ;;  %3451 = vmatprep.mubr.bf16.mxu1 %v7175_v18 }
 0x2ee   :  { %v5312_v56 = vadd.f32 %v2831_v19, %v7594_v52  ;;  %v2833_v0 = vpop.f32.mrb[53].mxu0  ;;  %3452 = vmatmul.mubr.bf16.gmra.mrb[104].mxu1 %v7137_v43 }
 0x2ef   :  { %v5313_v41 = vadd.f32 %v2833_v0, %v7595_v21  ;;  %v2835_v25 = vpop.f32.mrb[54].mxu0  ;;  %3689 = vmatpush1.bf16.msra.mxu1 %v5933_v38  ;;  %v5951_v0 = vld [vmem:[%s7530_s3 + $0xe0] ss:$8 sps:$4 sm:$0xff]   ;;  %v5956_v21 = vld [vmem:[%s7530_s3 + $0xf4] ss:$8 sps:$4 sm:$0xff]  }
 0x2f0   :  { %v5314_v22 = vadd.f32 %v2835_v25, %v7596_v3  ;;  %v2837_v58 = vpop.f32.mrb[55].mxu0  ;;  %3690 = vmatprep.subr.bf16.mxu1 %v5938_v39  ;;  %v7605_v39 = vld [vmem:[#allocation17_spill] sm:$0xff]  ;;  %v7606_v3 = vld [vmem:[#allocation18_spill] sm:$0xff] }
 0x2f1   :  { %v3062_v42 = vmax.f32 %v5312_v56, %v5313_v41  ;;  %v5315_v23 = vadd.f32 %v2837_v58, %v7597_v5 }
 0x2f3   :  { %v3096_v60 = vmax.f32 %v3060_v54, %v3062_v42  ;;  %v3063_v24 = vmax.f32 %v5314_v22, %v5315_v23  ;;  %3691 = vmatpush1.bf16.msra.mxu1 %v5936_v14  ;;  %v7604_v54 = vld [vmem:[#allocation16_spill] sm:$0xff]  ;;  %v7607_v42 = vld [vmem:[#allocation19_spill] sm:$0xff] }
 0x2f4   :  { %3692 = vmatprep.subr.bf16.mxu1 %v5941_v4 }
 0x2f5   :  { %v3127_v6 = vadd.f32 %v7055_v53, %v3096_v60  ;;  %v3097_v59 = vmax.f32 %v3061_v45, %v3063_v24  ;;  %v2841_v26 = vpop.f32.mrb[56].mxu0  ;;  %v5953_v45 = vld [vmem:[%s7530_s3 + $0xe4] ss:$8 sps:$4 sm:$0xff]   ;;  %v5954_v60 = vld [vmem:[%s7530_s3 + $0xf0] ss:$8 sps:$4 sm:$0xff]  }
 0x2f6   :  { %v5316_v16 = vadd.f32 %v2841_v26, %v7598_v46  ;;  %v2843_v15 = vpop.f32.mrb[57].mxu0  ;;  %v7608_v24 = vld [vmem:[#allocation20_spill] sm:$0xff] }
 0x2f7   :  { %v3128_v40 = vadd.f32 %v7055_v53, %v3097_v59  ;;  %v5317_v27 = vadd.f32 %v2843_v15, %v7599_v8  ;;  %v2845_v47 = vpop.f32.mrb[58].mxu0  ;;  %3693 = vmatpush1.bf16.msra.mxu1 %v5939_v7  ;;  %v3151_v9 = vmax.f32 %v3127_v6, 0.0  ;;  %v5959_v6 = vld [vmem:[%s7530_s3 + $0x204] ss:$8 sps:$4 sm:$0xff]  }
 0x2f8   :  { %v5318_v29 = vadd.f32 %v2845_v47, %v7600_v20  ;;  %v2847_v48 = vpop.f32.mrb[59].mxu0  ;;  %3694 = vmatprep.subr.bf16.mxu1 %v5944_v44  ;;  %v7610_v47 = vld [vmem:[#allocation22_spill] sm:$0xff] }
 0x2f9   :  { %v3152_v35 = vmax.f32 %v3128_v40, 0.0  ;;  %v3064_v1 = vmax.f32 %v5316_v16, %v5317_v27  ;;  %v5319_v61 = vadd.f32 %v2847_v48, %v7601_v31  ;;  %v7609_v16 = vld [vmem:[#allocation21_spill] sm:$0xff] }
 0x2fb   :  { %v7213_v10 = vpack.c.bf16 %v3152_v35, %v3151_v9  ;;  %v3065_v55 = vmax.f32 %v5318_v29, %v5319_v61  ;;  %3695 = vmatpush1.bf16.msra.mxu1 %v5942_v28  ;;  %v7611_v29 = vld [vmem:[#allocation23_spill] sm:$0xff]  ;;  %v7612_v9 = vld [vmem:[#allocation24_spill] sm:$0xff]  ;;  %v7613_v61 = vld [vmem:[#allocation25_spill] sm:$0xff] }
 0x2fc   :  { %3696 = vmatprep.subr.bf16.mxu1 %v5947_v49 }
 0x2fd   :  { %v2851_v13 = vpop.f32.mrb[60].mxu0  ;;  %3461 = vmatprep.mubr.bf16.mxu1 %v7213_v10 }
 0x2fe   :  { %v5320_v11 = vadd.f32 %v2851_v13, %v7602_v34  ;;  %v2853_v36 = vpop.f32.mrb[61].mxu0  ;;  %3462 = vmatmul.mubr.bf16.gmra.mrb[108].mxu1 %v7175_v18 }
 0x2ff   :  { %v5321_v62 = vadd.f32 %v2853_v36, %v7603_v2  ;;  %v2855_v51 = vpop.f32.mrb[62].mxu0  ;;  %3697 = vmatpush1.bf16.msra.mxu1 %v5945_v32  ;;  %v7614_v36 = vld [vmem:[#allocation26_spill] sm:$0xff] }
 0x300   :  { %v5322_v37 = vadd.f32 %v2855_v51, %v7604_v54  ;;  %v2857_v17 = vpop.f32.mrb[63].mxu0  ;;  %3698 = vmatprep.subr.bf16.mxu1 %v5950_v33 }
 0x301   :  { %v3066_v38 = vmax.f32 %v5320_v11, %v5321_v62  ;;  %v5323_v19 = vadd.f32 %v2857_v17, %v7605_v39  ;;  %v7616_v17 = vld [vmem:[#allocation28_spill] sm:$0xff] }
 0x303   :  { %v3098_v52 = vmax.f32 %v3064_v1, %v3066_v38  ;;  %v3067_v56 = vmax.f32 %v5322_v37, %v5323_v19  ;;  %3699 = vmatpush1.bf16.msra.mxu1 %v5948_v63  ;;  %v7615_v63 = vld [vmem:[#allocation27_spill] sm:$0xff] }
 0x304   :  { %3700 = vmatprep.subr.bf16.mxu1 %v5953_v45 }
 0x305   :  { %v3129_v41 = vadd.f32 %v7055_v53, %v3098_v52  ;;  %v3099_v25 = vmax.f32 %v3065_v55, %v3067_v56  ;;  %v2861_v14 = vpop.f32.mrb[64].mxu0  ;;  %v7617_v56 = vld [vmem:[#allocation29_spill] sm:$0xff] }
 0x306   :  { %v5324_v22 = vadd.f32 %v2861_v14, %v7606_v3  ;;  %v2863_v58 = vpop.f32.mrb[65].mxu0  ;;  %v7618_v14 = vld [vmem:[#allocation30_spill] sm:$0xff] }
 0x307   :  { %v3130_v4 = vadd.f32 %v7055_v53, %v3099_v25  ;;  %v5325_v5 = vadd.f32 %v2863_v58, %v7607_v42  ;;  %v2865_v23 = vpop.f32.mrb[66].mxu0  ;;  %3701 = vmatpush1.bf16.msra.mxu1 %v5951_v0  ;;  %v3153_v59 = vmax.f32 %v3129_v41, 0.0  ;;  %v7619_v58 = vld [vmem:[#allocation31_spill] sm:$0xff] }
 0x308   :  { %v5326_v7 = vadd.f32 %v2865_v23, %v7608_v24  ;;  %v2867_v44 = vpop.f32.mrb[67].mxu0  ;;  %3702 = vmatprep.subr.bf16.mxu1 %v5956_v21 }
 0x309   :  { %v3154_v26 = vmax.f32 %v3130_v4, 0.0  ;;  %v3068_v46 = vmax.f32 %v5324_v22, %v5325_v5  ;;  %v5327_v15 = vadd.f32 %v2867_v44, %v7609_v16  ;;  %v7620_v5 = vld [vmem:[#allocation32_spill] sm:$0xff] }
 0x30b   :  { %v7251_v40 = vpack.c.bf16 %v3154_v26, %v3153_v59  ;;  %v3069_v8 = vmax.f32 %v5326_v7, %v5327_v15  ;;  %3703 = vmatpush1.bf16.msra.mxu1 %v5954_v60  ;;  %v7621_v7 = vld [vmem:[#allocation33_spill] sm:$0xff]  ;;  %v7622_v15 = vld [vmem:[#allocation34_spill] sm:$0xff] }
 0x30c   :  { %3881 = vmatprep.subr.bf16.mxu1 %v5959_v6 }
 0x30d   :  { %v2871_v27 = vpop.f32.mrb[68].mxu0  ;;  %3471 = vmatprep.mubr.bf16.mxu1 %v7251_v40 }
 0x30e   :  { %v5328_v28 = vadd.f32 %v2871_v27, %v7610_v47  ;;  %v2873_v20 = vpop.f32.mrb[69].mxu0  ;;  %3472 = vmatmul.mubr.bf16.gmra.mrb[112].mxu1 %v7213_v10  ;;  %v7623_v47 = vld [vmem:[#allocation35_spill] sm:$0xff] }
 0x30f   :  { %v5329_v48 = vadd.f32 %v2873_v20, %v7611_v29  ;;  %v2875_v49 = vpop.f32.mrb[70].mxu0 }
 0x310   :  { %v5330_v35 = vadd.f32 %v2875_v49, %v7612_v9  ;;  %v2877_v1 = vpop.f32.mrb[71].mxu0 }
 0x311   :  { %v3070_v31 = vmax.f32 %v5328_v28, %v5329_v48  ;;  %v5331_v55 = vadd.f32 %v2877_v1, %v7613_v61  ;;  %v7624_v48 = vld [vmem:[#allocation36_spill] sm:$0xff]  ;;  %v7625_v1 = vld [vmem:[#allocation37_spill] sm:$0xff] }
 0x313   :  { %v3100_v32 = vmax.f32 %v3068_v46, %v3070_v31  ;;  %v3071_v33 = vmax.f32 %v5330_v35, %v5331_v55 }
 0x315   :  { %v3131_v13 = vadd.f32 %v7055_v53, %v3100_v32  ;;  %v3101_v34 = vmax.f32 %v3069_v8, %v3071_v33  ;;  %v2881_v11 = vpop.f32.mrb[72].mxu0 }
 0x316   :  { %v5332_v2 = vadd.f32 %v2881_v11, %v7614_v36  ;;  %v2883_v62 = vpop.f32.mrb[73].mxu0 }
 0x317   :  { %v3132_v51 = vadd.f32 %v7055_v53, %v3101_v34  ;;  %v5333_v54 = vadd.f32 %v2883_v62, %v7615_v63  ;;  %v2885_v37 = vpop.f32.mrb[74].mxu0  ;;  %v3155_v39 = vmax.f32 %v3131_v13, 0.0  ;;  %v7626_v34 = vld [vmem:[#allocation38_spill] sm:$0xff]  ;;  %v7628_v63 = vld [vmem:[#allocation40_spill] sm:$0xff] }
 0x318   :  { %v5334_v45 = vadd.f32 %v2885_v37, %v7616_v17  ;;  %v2887_v38 = vpop.f32.mrb[75].mxu0 }
 0x319   :  { %v3156_v19 = vmax.f32 %v3132_v51, 0.0  ;;  %v3072_v52 = vmax.f32 %v5332_v2, %v5333_v54  ;;  %v5335_v0 = vadd.f32 %v2887_v38, %v7617_v56  ;;  %v7627_v2 = vld [vmem:[#allocation39_spill] sm:$0xff] }
 0x31b   :  { %v3073_v21 = vmax.f32 %v5334_v45, %v5335_v0  ;;  %v7265_v41 = vpack.c.bf16 %v3156_v19, %v3155_v39  ;;  %v7629_v45 = vld [vmem:[#allocation41_spill] sm:$0xff] }
 0x31d   :  { %v2891_v25 = vpop.f32.mrb[76].mxu0  ;;  %3481 = vmatprep.mubr.bf16.mxu1 %v7265_v41 }
 0x31e   :  { %v5336_v3 = vadd.f32 %v2891_v25, %v7618_v14  ;;  %v2893_v22 = vpop.f32.mrb[77].mxu0  ;;  %3482 = vmatmul.mubr.bf16.gmra.mrb[116].mxu1 %v7251_v40 }
 0x31f   :  { %v5337_v4 = vadd.f32 %v2893_v22, %v7619_v58  ;;  %v2895_v42 = vpop.f32.mrb[78].mxu0 }
 0x320   :  { %v5338_v23 = vadd.f32 %v2895_v42, %v7620_v5  ;;  %v2897_v60 = vpop.f32.mrb[79].mxu0  ;;  %v7632_v42 = vld [vmem:[#allocation44_spill] sm:$0xff] }
 0x321   :  { %v3074_v24 = vmax.f32 %v5336_v3, %v5337_v4  ;;  %v5339_v44 = vadd.f32 %v2897_v60, %v7621_v7  ;;  %v7631_v3 = vld [vmem:[#allocation43_spill] sm:$0xff] }
 0x323   :  { %v3102_v6 = vmax.f32 %v3072_v52, %v3074_v24  ;;  %v3075_v59 = vmax.f32 %v5338_v23, %v5339_v44  ;;  %v7633_v24 = vld [vmem:[#allocation45_spill] sm:$0xff] }
 0x325   :  { %v3103_v26 = vmax.f32 %v3073_v21, %v3075_v59  ;;  %v2901_v46 = vpop.f32.mrb[80].mxu0  ;;  %v3133_v16 = vadd.f32 %v7055_v53, %v3102_v6  ;;  %v7630_v21 = vld [vmem:[#allocation42_spill] sm:$0xff] }
 0x326   :  { %v5340_v8 = vadd.f32 %v2901_v46, %v7622_v15  ;;  %v2903_v27 = vpop.f32.mrb[81].mxu0 }
 0x327   :  { %v5341_v28 = vadd.f32 %v2903_v27, %v7623_v47  ;;  %v2905_v20 = vpop.f32.mrb[82].mxu0  ;;  %v3134_v29 = vadd.f32 %v7055_v53, %v3103_v26  ;;  %v3157_v61 = vmax.f32 %v3133_v16, 0.0  ;;  %v7634_v16 = vld [vmem:[#allocation46_spill] sm:$0xff]  ;;  %v7635_v27 = vld [vmem:[#allocation47_spill] sm:$0xff] }
 0x328   :  { %v5342_v49 = vadd.f32 %v2905_v20, %v7624_v48  ;;  %v2907_v9 = vpop.f32.mrb[83].mxu0  ;;  %v7636_v20 = vld [vmem:[#allocation48_spill] sm:$0xff] }
 0x329   :  { %v3076_v35 = vmax.f32 %v5340_v8, %v5341_v28  ;;  %v5343_v31 = vadd.f32 %v2907_v9, %v7625_v1  ;;  %v3158_v55 = vmax.f32 %v3134_v29, 0.0  ;;  %v7637_v9 = vld [vmem:[#allocation49_spill] sm:$0xff] }
 0x32b   :  { %v3077_v32 = vmax.f32 %v5342_v49, %v5343_v31  ;;  %v7279_v33 = vpack.c.bf16 %v3158_v55, %v3157_v61  ;;  %v5957_v61 = vld [vmem:[%s7530_s3 + $0x200] ss:$8 sps:$4 sm:$0xff]   ;;  %v5962_v55 = vld [vmem:[%s7530_s3 + $0x214] ss:$8 sps:$4 sm:$0xff]  }
 0x32d   :  { %v2911_v13 = vpop.f32.mrb[84].mxu0  ;;  %3491 = vmatprep.mubr.bf16.mxu1 %v7279_v33 }
 0x32e   :  { %v5344_v11 = vadd.f32 %v2911_v13, %v7626_v34  ;;  %v2913_v36 = vpop.f32.mrb[85].mxu0  ;;  %3492 = vmatmul.mubr.bf16.gmra.mrb[120].mxu1 %v7265_v41  ;;  %v5960_v13 = vld [vmem:[%s7530_s3 + $0x210] ss:$8 sps:$4 sm:$0xff]  }
 0x32f   :  { %v5345_v62 = vadd.f32 %v2913_v36, %v7627_v2  ;;  %v2915_v51 = vpop.f32.mrb[86].mxu0  ;;  %v5963_v2 = vld [vmem:[%s7530_s3 + $0x220] ss:$8 sps:$4 sm:$0xff]  }
 0x330   :  { %v5346_v54 = vadd.f32 %v2915_v51, %v7628_v63  ;;  %v2917_v37 = vpop.f32.mrb[87].mxu0 }
 0x331   :  { %v3078_v17 = vmax.f32 %v5344_v11, %v5345_v62  ;;  %v5347_v38 = vadd.f32 %v2917_v37, %v7629_v45  ;;  %v5965_v11 = vld [vmem:[%s7530_s3 + $0x224] ss:$8 sps:$4 sm:$0xff]   ;;  %v5969_v37 = vld [vmem:[%s7530_s3 + $0x240] ss:$8 sps:$4 sm:$0xff]  }
 0x332   :  { %v5977_v45 = vld [vmem:[%s7530_s3 + $0x264] ss:$8 sps:$4 sm:$0xff]  }
 0x333   :  { %v3104_v39 = vmax.f32 %v3076_v35, %v3078_v17  ;;  %v3079_v19 = vmax.f32 %v5346_v54, %v5347_v38  ;;  %v5966_v54 = vld [vmem:[%s7530_s3 + $0x230] ss:$8 sps:$4 sm:$0xff]   ;;  %v5974_v17 = vld [vmem:[%s7530_s3 + $0x254] ss:$8 sps:$4 sm:$0xff]   ;;  %v5975_v38 = vld [vmem:[%s7530_s3 + $0x260] ss:$8 sps:$4 sm:$0xff]  }
 0x335   :  { %v3105_v52 = vmax.f32 %v3077_v32, %v3079_v19  ;;  %v2921_v56 = vpop.f32.mrb[88].mxu0  ;;  %v3135_v0 = vadd.f32 %v7055_v53, %v3104_v39  ;;  %v5978_v39 = vld [vmem:[%s7530_s3 + $0x270] ss:$8 sps:$4 sm:$0xff]   ;;  %v5981_v19 = vld [vmem:[%s7532_s5 + $0x40] sm:$0xff]  }
 0x336   :  { %v5348_v25 = vadd.f32 %v2921_v56, %v7630_v21  ;;  %v2923_v14 = vpop.f32.mrb[89].mxu0  ;;  %v5983_v56 = vld [vmem:[%s7532_s5 + $0x48] sm:$0xff]   ;;  %v5985_v21 = vld [vmem:[%s7532_s5 + $0x50] sm:$0xff]  }
 0x337   :  { %v5349_v22 = vadd.f32 %v2923_v14, %v7631_v3  ;;  %v2925_v58 = vpop.f32.mrb[90].mxu0  ;;  %v3136_v4 = vadd.f32 %v7055_v53, %v3105_v52  ;;  %v3159_v44 = vmax.f32 %v3135_v0, 0.0  ;;  %v5982_v52 = vld [vmem:[%s7532_s5] sm:$0xff]   ;;  %v5984_v0 = vld [vmem:[%s7532_s5 + $0x8] sm:$0xff]   ;;  %v5993_v14 = vld [vmem:[%s7532_s5 + $0x70] sm:$0xff]  }
 0x338   :  { %v5350_v5 = vadd.f32 %v2925_v58, %v7632_v42  ;;  %v2927_v23 = vpop.f32.mrb[91].mxu0  ;;  %v5994_v3 = vld [vmem:[%s7532_s5 + $0x30] sm:$0xff]   ;;  %v5996_v58 = vld [vmem:[%s7532_s5 + $0x38] sm:$0xff]   ;;  %v4052_v42 = vlaneseq }
 0x339   :  { %v3080_v60 = vmax.f32 %v5348_v25, %v5349_v22  ;;  %v5351_v7 = vadd.f32 %v2927_v23, %v7633_v24  ;;  %v3160_v6 = vmax.f32 %v3136_v4, 0.0  ;;  %v5986_v25 = vld [vmem:[%s7532_s5 + $0x10] sm:$0xff]   ;;  %v5995_v22 = vld [vmem:[%s7532_s5 + $0x78] sm:$0xff]   ;;  %v5997_v4 = vld [vmem:[%s7532_s5 + $0xc0] sm:$0xff]  }
 0x33b   :  { %v3081_v59 = vmax.f32 %v5350_v5, %v5351_v7  ;;  %v7293_v26 = vpack.c.bf16 %v3160_v6, %v3159_v44  ;;  %v7431_v7 = vshrl.u32 %v4052_v42, 7 }
 0x33d   :  { %v2931_v46 = vpop.f32.mrb[92].mxu0  ;;  %3501 = vmatprep.mubr.bf16.mxu1 %v7293_v26 }
 0x33e   :  { %v5352_v15 = vadd.f32 %v2931_v46, %v7634_v16  ;;  %v2933_v8 = vpop.f32.mrb[93].mxu0  ;;  %3502 = vmatmul.mubr.bf16.gmra.mrb[124].mxu1 %v7279_v33 }
 0x33f   :  { %v5353_v47 = vadd.f32 %v2933_v8, %v7635_v27  ;;  %v2935_v28 = vpop.f32.mrb[94].mxu0  ;;  %3704 = vmatprep.mubr.bf16.mxu1 %v7075_v30 }
 0x340   :  { %v5354_v29 = vadd.f32 %v2935_v28, %v7636_v20  ;;  %v2937_v48 = vpop.f32.mrb[95].mxu0 }
 0x341   :  { %v3082_v49 = vmax.f32 %v5352_v15, %v5353_v47  ;;  %v5355_v35 = vadd.f32 %v2937_v48, %v7637_v9 }
 0x343   :  { %v3106_v1 = vmax.f32 %v3080_v60, %v3082_v49  ;;  %v3083_v31 = vmax.f32 %v5354_v29, %v5355_v35 }
 0x345   :  { %v3107_v32 = vmax.f32 %v3081_v59, %v3083_v31  ;;  %v3137_v34 = vadd.f32 %v7055_v53, %v3106_v1  ;;  %v4054_v59 = vsub.s32 0, %v7431_v7 }
 0x346   :  { %3705 = vmatmul.mubr.bf16.vlgmr.msra.gmra.mrb[96].mxu1 %v7063_v12  ;;  %v5968_v12 = vld [vmem:[%s7530_s3 + $0x234] ss:$8 sps:$4 sm:$0xff]  }
 0x347   :  { %3714 = vmatprep.mubr.bf16.mxu1 %v7087_v57  ;;  %3882 = vmatpush1.bf16.msra.mxu1 %v5957_v61  ;;  %v3138_v36 = vadd.f32 %v7055_v53, %v3107_v32  ;;  %v3161_v62 = vmax.f32 %v3137_v34, 0.0  ;;  %v5971_v53 = vld [vmem:[%s7530_s3 + $0x244] ss:$8 sps:$4 sm:$0xff]  }
 0x348   :  { %3883 = vmatprep.subr.bf16.mxu1 %v5962_v55 }
 0x349   :  { %v3162_v51 = vmax.f32 %v3138_v36, 0.0 }
 0x34b   :  { %3884 = vmatpush1.bf16.msra.mxu1 %v5960_v13  ;;  %v3174_v63 = vpack.c.bf16 %v3162_v51, %v3161_v62 }
 0x34c   :  { %3885 = vmatprep.subr.bf16.mxu1 %v5965_v11  ;;  %v4058_v11 = vsub.s32 1, %v7431_v7 }
 0x34e   :  { %3715 = vmatmul.mubr.bf16.gmra.mrb[100].mxu1 %v7075_v30  ;;  %v5972_v30 = vld [vmem:[%s7530_s3 + $0x250] ss:$8 sps:$4 sm:$0xff]  }
 0x34f   :  { %3724 = vmatprep.mubr.bf16.mxu1 %v7099_v50  ;;  %3886 = vmatpush1.bf16.msra.mxu1 %v5963_v2 }
 0x350   :  { %3887 = vmatprep.subr.bf16.mxu1 %v5968_v12 }
 0x353   :  { %3888 = vmatpush1.bf16.msra.mxu1 %v5966_v54 }
 0x354   :  { %3889 = vmatprep.subr.bf16.mxu1 %v5971_v53 }
 0x356   :  { %3725 = vmatmul.mubr.bf16.gmra.mrb[104].mxu1 %v7087_v57  ;;  %v5980_v57 = vld [vmem:[%s7530_s3 + $0x274] ss:$8 sps:$4 sm:$0xff]  }
 0x357   :  { %3734 = vmatprep.mubr.bf16.mxu1 %v7137_v43  ;;  %3890 = vmatpush1.bf16.msra.mxu1 %v5969_v37 }
 0x358   :  { %3891 = vmatprep.subr.bf16.mxu1 %v5974_v17 }
 0x35b   :  { %3892 = vmatpush1.bf16.msra.mxu1 %v5972_v30 }
 0x35c   :  { %3893 = vmatprep.subr.bf16.mxu1 %v5977_v45 }
 0x35e   :  { %3735 = vmatmul.mubr.bf16.gmra.mrb[108].mxu1 %v7099_v50  ;;  %v7638_v50 = vmov 0  }
 0x35f   :  { %3744 = vmatprep.mubr.bf16.mxu1 %v7175_v18  ;;  %3894 = vmatpush1.bf16.msra.mxu1 %v5975_v38 }
 0x360   :  { %3895 = vmatprep.subr.bf16.mxu1 %v5980_v57 }
 0x363   :  { %3896 = vmatpush1.bf16.msra.mxu1 %v5978_v39 }
 0x364   :  { %5183 = vmatprep.subr.bf16.mxu1 %v5981_v19 }
 0x366   :  { %3745 = vmatmul.mubr.bf16.gmra.mrb[112].mxu1 %v7137_v43 }
 0x367   :  { %3754 = vmatprep.mubr.bf16.mxu1 %v7213_v10 }
 0x36e   :  { %3755 = vmatmul.mubr.bf16.gmra.mrb[116].mxu1 %v7175_v18 }
 0x36f   :  { %3764 = vmatprep.mubr.bf16.mxu1 %v7251_v40 }
 0x376   :  { %3765 = vmatmul.mubr.bf16.gmra.mrb[120].mxu1 %v7213_v10 }
 0x377   :  { %3774 = vmatprep.mubr.bf16.mxu1 %v7265_v41 }
 0x37e   :  { %3775 = vmatmul.mubr.bf16.gmra.mrb[124].mxu1 %v7251_v40 }
 0x37f   :  { %3913 = vmatprep.mubr.bf16.mxu1 %v7638_v50 }
 0x386   :  { %3914 = vmatmul.mubr.bf16.vlgmr.msra.gmra.mrb[96].mxu1 %v7137_v43  ;;  %v5987_v43 = vld [vmem:[%s7532_s5 + $0x58] sm:$0xff]  }
 0x387   :  { %3923 = vmatprep.mubr.bf16.mxu1 %v7638_v50  ;;  %5184 = vmatpush3.bf16.msra.mxu1 %v5982_v52 }
 0x388   :  { %5185 = vmatprep.subr.bf16.mxu1 %v5983_v56 }
 0x38b   :  { %5186 = vmatpush3.bf16.msra.mxu1 %v5984_v0 }
 0x38c   :  { %5187 = vmatprep.subr.bf16.mxu1 %v5985_v21  ;;  %v5998_v21 = vld [vmem:[%s7532_s5 + $0x80] sm:$0xff]  }
 0x38e   :  { %3924 = vmatmul.mubr.bf16.gmra.mrb[100].mxu1 %v7175_v18  ;;  %v5988_v18 = vld [vmem:[%s7532_s5 + $0x18] sm:$0xff]  }
 0x38f   :  { %3933 = vmatprep.mubr.bf16.mxu1 %v7638_v50  ;;  %5188 = vmatpush3.bf16.msra.mxu1 %v5986_v25  ;;  %v5999_v25 = vld [vmem:[%s7532_s5 + $0xc8] sm:$0xff]  }
 0x390   :  { %5189 = vmatprep.subr.bf16.mxu1 %v5987_v43  ;;  %v4062_v43 = vsub.s32 2, %v7431_v7 }
 0x393   :  { %5190 = vmatpush3.bf16.msra.mxu1 %v5988_v18 }
 0x396   :  { %3934 = vmatmul.mubr.bf16.gmra.mrb[104].mxu1 %v7213_v10  ;;  %v5989_v10 = vld [vmem:[%s7532_s5 + $0x60] sm:$0xff]  }
 0x397   :  { %3943 = vmatprep.mubr.bf16.mxu1 %v7638_v50  ;;  %5191 = vmatprep.subr.bf16.mxu1 %v5989_v10  ;;  %v6000_v10 = vld [vmem:[%s7532_s5 + $0x88] sm:$0xff]  }
 0x39e   :  { %3944 = vmatmul.mubr.bf16.gmra.mrb[108].mxu1 %v7251_v40  ;;  %v5990_v40 = vld [vmem:[%s7532_s5 + $0x20] sm:$0xff]  }
 0x39f   :  { %3953 = vmatprep.mubr.bf16.mxu1 %v7638_v50  ;;  %5192 = vmatpush3.bf16.msra.mxu1 %v5990_v40 }
 0x3a6   :  { %3954 = vmatmul.mubr.bf16.gmra.mrb[112].mxu1 %v7265_v41  ;;  %v5991_v41 = vld [vmem:[%s7532_s5 + $0x68] sm:$0xff]  }
 0x3a7   :  { %3963 = vmatprep.mubr.bf16.mxu1 %v7638_v50  ;;  %5193 = vmatprep.subr.bf16.mxu1 %v5991_v41  ;;  %v6001_v41 = vld [vmem:[%s7532_s5 + $0xd0] sm:$0xff]  }
 0x3ae   :  { %3964 = vmatmul.mubr.bf16.gmra.mrb[116].mxu1 %v7279_v33  ;;  %v5992_v33 = vld [vmem:[%s7532_s5 + $0x28] sm:$0xff]  }
 0x3af   :  { %3973 = vmatprep.mubr.bf16.mxu1 %v7638_v50  ;;  %5194 = vmatpush3.bf16.msra.mxu1 %v5992_v33 }
 0x3b0   :  { %5195 = vmatprep.subr.bf16.mxu1 %v5993_v14 }
 0x3b3   :  { %5196 = vmatpush3.bf16.msra.mxu1 %v5994_v3 }
 0x3b4   :  { %5197 = vmatprep.subr.bf16.mxu1 %v5995_v22 }
 0x3b6   :  { %3974 = vmatmul.mubr.bf16.gmra.mrb[120].mxu1 %v7293_v26  ;;  %v7437_v26 = vld [vmem:[%s7533_s4] sm:$0xf] }
 0x3b7   :  { %3983 = vmatprep.mubr.bf16.mxu1 %v7638_v50  ;;  %5198 = vmatpush3.bf16.msra.mxu1 %v5996_v58  ;;  %v4055_v8 = vrot.slane %v7437_v26, %v4054_v59  ;;  %v4059_v51 = vrot.slane %v7437_v26, %v4058_v11  ;;  %v4063_v14 = vrot.slane %v7437_v26, %v4062_v43  ;;  %v6004_v59 = vld [vmem:[%s7532_s5 + $0x98] sm:$0xff]  }
 0x3b8   :  { %5205 = vmatprep.subr.bf16.mxu1 %v5997_v4 }
 0x3be   :  { %3984 = vmatmul.mubr.bf16.gmra.mrb[124].mxu1 %v3174_v63 }
 0x459   :  { %v3915_v5 = vpop.f32.mrb[96].mxu1 }
 0x45a   :  { %v3917_v23 = vpop.f32.mrb[97].mxu1 }
 0x45b   :  { %v4026_v60 = vmax.f32 %v3915_v5, %v3917_v23  ;;  %v3919_v24 = vpop.f32.mrb[98].mxu1  ;;  %v6002_v5 = vld [vmem:[%s7532_s5 + $0x90] sm:$0xff]   ;;  %v6003_v23 = vld [vmem:[%s7532_s5 + $0xd8] sm:$0xff]  }
 0x45c   :  { %v3921_v44 = vpop.f32.mrb[99].mxu1 }
 0x45d   :  { %v4027_v6 = vmax.f32 %v3919_v24, %v3921_v44 }
 0x461   :  { %v3925_v46 = vpop.f32.mrb[100].mxu1 }
 0x462   :  { %v3927_v16 = vpop.f32.mrb[101].mxu1 }
 0x463   :  { %v4028_v15 = vmax.f32 %v3925_v46, %v3927_v16  ;;  %v3929_v27 = vpop.f32.mrb[102].mxu1  ;;  %v6005_v16 = vld [vmem:[%s7532_s5 + $0xe0] sm:$0xff]  }
 0x464   :  { %v3931_v47 = vpop.f32.mrb[103].mxu1 }
 0x465   :  { %v4042_v28 = vmax.f32 %v4026_v60, %v4028_v15  ;;  %v4029_v20 = vmax.f32 %v3929_v27, %v3931_v47 }
 0x467   :  { %v4072_v29 = vadd.f32 %v4055_v8, %v4042_v28  ;;  %v4043_v48 = vmax.f32 %v4027_v6, %v4029_v20 }
 0x469   :  { %v4076_v49 = vadd.f32 %v4055_v8, %v4043_v48  ;;  %v3935_v9 = vpop.f32.mrb[104].mxu1  ;;  %v4080_v1 = vmax.f32 %v4072_v29, 0.0  ;;  %v6006_v48 = vld [vmem:[%s7532_s5 + $0xa0] sm:$0xff]  }
 0x46a   :  { %v3937_v35 = vpop.f32.mrb[105].mxu1 }
 0x46b   :  { %v4084_v31 = vmax.f32 %v4076_v49, 0.0  ;;  %v4030_v61 = vmax.f32 %v3935_v9, %v3937_v35  ;;  %v3939_v55 = vpop.f32.mrb[106].mxu1  ;;  %v6007_v49 = vld [vmem:[%s7532_s5 + $0xe8] sm:$0xff]   ;;  %v4066_v9 = vsub.s32 3, %v7431_v7  ;;  %v6010_v7 = vld [vmem:[%s7532_s5 + $0xb0] sm:$0xff]  }
 0x46c   :  { %v3941_v32 = vpop.f32.mrb[107].mxu1 }
 0x46d   :  { %v4088_v13 = vpack.c.bf16 %v4084_v31, %v4080_v1  ;;  %v4031_v34 = vmax.f32 %v3939_v55, %v3941_v32  ;;  %v6008_v1 = vld [vmem:[%s7532_s5 + $0xa8] sm:$0xff]   ;;  %v4067_v32 = vrot.slane %v7437_v26, %v4066_v9  ;;  %v6012_v26 = vld [vmem:[%s7532_s5 + $0xb8] sm:$0xff]  }
 0x471   :  { %v3945_v36 = vpop.f32.mrb[108].mxu1 }
 0x472   :  { %v3947_v2 = vpop.f32.mrb[109].mxu1 }
 0x473   :  { %v4032_v62 = vmax.f32 %v3945_v36, %v3947_v2  ;;  %v3949_v12 = vpop.f32.mrb[110].mxu1  ;;  %v6011_v2 = vld [vmem:[%s7532_s5 + $0xf8] sm:$0xff]  }
 0x474   :  { %v3951_v63 = vpop.f32.mrb[111].mxu1 }
 0x475   :  { %v4044_v54 = vmax.f32 %v4030_v61, %v4032_v62  ;;  %v4033_v53 = vmax.f32 %v3949_v12, %v3951_v63  ;;  %v6009_v61 = vld [vmem:[%s7532_s5 + $0xf0] sm:$0xff]  }
 0x477   :  { %v4073_v37 = vadd.f32 %v4059_v51, %v4044_v54  ;;  %v4045_v17 = vmax.f32 %v4031_v34, %v4033_v53 }
 0x479   :  { %v4077_v30 = vadd.f32 %v4059_v51, %v4045_v17  ;;  %v3955_v45 = vpop.f32.mrb[112].mxu1  ;;  %v4081_v57 = vmax.f32 %v4073_v37, 0.0  ;;  %v6030_v37 = vmov 0.0   ;;  %v6013_v17 = vld [vmem:[%s7534_s7] sm:$0xff]  }
 0x47a   :  { %v3957_v38 = vpop.f32.mrb[113].mxu1 }
 0x47b   :  { %v4085_v39 = vmax.f32 %v4077_v30, 0.0  ;;  %v4034_v19 = vmax.f32 %v3955_v45, %v3957_v38  ;;  %v3959_v50 = vpop.f32.mrb[114].mxu1  ;;  %v6014_v30 = vld [vmem:[%s7534_s7 + $0x8] sm:$0xff]   ;;  %v6015_v45 = vld [vmem:[%s7534_s7 + $0x10] sm:$0xff]   ;;  %v6016_v38 = vld [vmem:[%s7534_s7 + $0x18] sm:$0xff]  }
 0x47c   :  { %v3961_v52 = vpop.f32.mrb[115].mxu1 }
 0x47d   :  { %v4035_v56 = vmax.f32 %v3959_v50, %v3961_v52  ;;  %v4089_v0 = vpack.c.bf16 %v4085_v39, %v4081_v57  ;;  %v6017_v57 = vld [vmem:[%s7534_s7 + $0x20] sm:$0xff]   ;;  %v6018_v39 = vld [vmem:[%s7534_s7 + $0x28] sm:$0xff]   ;;  %v6020_v50 = vld [vmem:[%s7534_s7 + $0x38] sm:$0xff]  }
 0x47f   :  { %4387 = vmatprep.mubr.bf16.mxu1 %v4089_v0 }
 0x480   :  { %4388 = vmatmul.mubr.bf16.vlgmr.msra.gmra.mrb[128].mxu1 %v4088_v13 }
 0x481   :  { %v3965_v18 = vpop.f32.mrb[116].mxu1  ;;  %5206 = vmatpush3.bf16.msra.mxu1 %v5998_v21 }
 0x482   :  { %v3967_v40 = vpop.f32.mrb[117].mxu1  ;;  %5207 = vmatprep.subr.bf16.mxu1 %v5999_v25 }
 0x483   :  { %v4036_v33 = vmax.f32 %v3965_v18, %v3967_v40  ;;  %v3969_v3 = vpop.f32.mrb[118].mxu1  ;;  %v5141_v18 = vld [vmem:[%s7535_s6] ss:$0 sm:$0xff] }
 0x484   :  { %v3971_v22 = vpop.f32.mrb[119].mxu1 }
 0x485   :  { %v4046_v58 = vmax.f32 %v4034_v19, %v4036_v33  ;;  %v4037_v4 = vmax.f32 %v3969_v3, %v3971_v22  ;;  %5208 = vmatpush3.bf16.msra.mxu1 %v6000_v10  ;;  %v6019_v19 = vld [vmem:[%s7534_s7 + $0x30] sm:$0xff]  }
 0x486   :  { %5209 = vmatprep.subr.bf16.mxu1 %v6001_v41 }
 0x487   :  { %v4074_v60 = vadd.f32 %v4063_v14, %v4046_v58  ;;  %v4047_v24 = vmax.f32 %v4035_v56, %v4037_v4 }
 0x489   :  { %v4078_v44 = vadd.f32 %v4063_v14, %v4047_v24  ;;  %v3975_v6 = vpop.f32.mrb[120].mxu1  ;;  %5210 = vmatpush3.bf16.msra.mxu1 %v6002_v5  ;;  %v4082_v15 = vmax.f32 %v4074_v60, 0.0 }
 0x48a   :  { %v3977_v46 = vpop.f32.mrb[121].mxu1  ;;  %5211 = vmatprep.subr.bf16.mxu1 %v6003_v23 }
 0x48b   :  { %v4086_v8 = vmax.f32 %v4078_v44, 0.0  ;;  %v4038_v27 = vmax.f32 %v3975_v6, %v3977_v46  ;;  %v3979_v47 = vpop.f32.mrb[122].mxu1  ;;  %v5174_v44 = vld [vmem:[%s7536_s8] ss:$0 sm:$0xff]  ;;  %v4555_v6 = vand.u32 127, %v4052_v42 }
 0x48c   :  { %v3981_v28 = vpop.f32.mrb[123].mxu1 }
 0x48d   :  { %v4090_v20 = vpack.c.bf16 %v4086_v8, %v4082_v15  ;;  %v4039_v29 = vmax.f32 %v3979_v47, %v3981_v28  ;;  %5212 = vmatpush3.bf16.msra.mxu1 %v6004_v59  ;;  %vm4556_vm3 = vcmp.lt.s32.totalorder %v4555_v6, 10 }
 0x48e   :  { %5213 = vmatprep.subr.bf16.mxu1 %v6005_v16 }
 0x491   :  { %v3985_v35 = vpop.f32.mrb[124].mxu1  ;;  %5214 = vmatpush3.bf16.msra.mxu1 %v6006_v48 }
 0x492   :  { %v3987_v31 = vpop.f32.mrb[125].mxu1  ;;  %5215 = vmatprep.subr.bf16.mxu1 %v6007_v49 }
 0x493   :  { %v4040_v55 = vmax.f32 %v3985_v35, %v3987_v31  ;;  %v3989_v13 = vpop.f32.mrb[126].mxu1 }
 0x494   :  { %v3991_v34 = vpop.f32.mrb[127].mxu1 }
 0x495   :  { %v4048_v11 = vmax.f32 %v4038_v27, %v4040_v55  ;;  %v4041_v36 = vmax.f32 %v3989_v13, %v3991_v34  ;;  %5216 = vmatpush3.bf16.msra.mxu1 %v6008_v1 }
 0x496   :  { %5217 = vmatprep.subr.bf16.mxu1 %v6009_v61 }
 0x497   :  { %v4075_v62 = vadd.f32 %v4067_v32, %v4048_v11  ;;  %v4049_v51 = vmax.f32 %v4039_v29, %v4041_v36 }
 0x499   :  { %v4079_v12 = vadd.f32 %v4067_v32, %v4049_v51  ;;  %5218 = vmatpush3.bf16.msra.mxu1 %v6010_v7  ;;  %v4083_v63 = vmax.f32 %v4075_v62, 0.0 }
 0x49a   :  { %5219 = vmatprep.subr.bf16.mxu1 %v6011_v2 }
 0x49b   :  { %v4087_v54 = vmax.f32 %v4079_v12, 0.0 }
 0x49d   :  { %5220 = vmatpush3.bf16.msra.mxu1 %v6012_v26  ;;  %v4091_v53 = vpack.c.bf16 %v4087_v54, %v4083_v63 }
 0x49e   :  { %5236 = vmatprep.subr.bf16.mxu1 %v6030_v37 }
 0x49f   :  { %4428 = vmatprep.mubr.bf16.mxu1 %v4091_v53 }
 0x4a0   :  { %4429 = vmatmul.mubr.bf16.vlgmr.msra.gmra.mrb[132].mxu1 %v4090_v20 }
 0x4a1   :  { %5237 = vmatpush3.bf16.msra.mxu1 %v6013_v17  ;;  %5252 = vmatprep.mubr.msk.bf16.mxu1 %vm6031_vm2, %v6030_v37 }
 0x4a2   :  { %5238 = vmatprep.subr.bf16.mxu1 %v6030_v37 }
 0x4a5   :  { %5239 = vmatpush3.bf16.msra.mxu1 %v6014_v30 }
 0x4a6   :  { %5240 = vmatprep.subr.bf16.mxu1 %v6030_v37 }
 0x4a9   :  { %5241 = vmatpush3.bf16.msra.mxu1 %v6015_v45 }
 0x4aa   :  { %5242 = vmatprep.subr.bf16.mxu1 %v6030_v37 }
 0x4ad   :  { %5243 = vmatpush3.bf16.msra.mxu1 %v6016_v38 }
 0x4ae   :  { %5244 = vmatprep.subr.bf16.mxu1 %v6030_v37 }
 0x4b1   :  { %5245 = vmatpush3.bf16.msra.mxu1 %v6017_v57 }
 0x4b2   :  { %5246 = vmatprep.subr.bf16.mxu1 %v6030_v37 }
 0x4b5   :  { %5247 = vmatpush3.bf16.msra.mxu1 %v6018_v39 }
 0x4b6   :  { %5248 = vmatprep.subr.bf16.mxu1 %v6030_v37 }
 0x4b9   :  { %5249 = vmatpush3.bf16.msra.mxu1 %v6019_v19 }
 0x4ba   :  { %5250 = vmatprep.subr.bf16.mxu1 %v6030_v37 }
 0x4bd   :  { %5251 = vmatpush3.bf16.msra.mxu1 %v6020_v50 }
 0x553   :  { %v5199_v52 = vpop.f32.mrb[128].mxu1 }
 0x554   :  { %v5200_v56 = vpop.f32.mrb[129].mxu1 }
 0x555   :  { %v5201_v0 = vadd.f32 %v5200_v56, %v5199_v52  ;;  %v5202_v21 = vpop.f32.mrb[130].mxu1 }
 0x556   :  { %v5203_v25 = vpop.f32.mrb[131].mxu1 }
 0x557   :  { %v5204_v43 = vadd.f32 %v5203_v25, %v5202_v21  ;;  %v4390_v41 = vadd.f32 %v5201_v0, %v5141_v18 }
 0x559   :  { %v4393_v22 = vadd.f32 %v5204_v43, %v5141_v18 }
 0x573   :  { %v5221_v10 = vpop.f32.mrb[132].mxu1 }
 0x574   :  { %v5222_v40 = vpop.f32.mrb[133].mxu1 }
 0x575   :  { %v5223_v33 = vadd.f32 %v5222_v40, %v5221_v10  ;;  %v5224_v14 = vpop.f32.mrb[134].mxu1 }
 0x576   :  { %v5225_v3 = vpop.f32.mrb[135].mxu1 }
 0x577   :  { %v4431_v58 = vadd.f32 %v5223_v33, %v4390_v41  ;;  %v5226_v4 = vadd.f32 %v5225_v3, %v5224_v14 }
 0x579   :  { %v4434_v5 = vadd.f32 %v5226_v4, %v4393_v22  ;;  %v4437_v23 = vmax.f32 %v4431_v58, 0.0 }
 0x57b   :  { %v4438_v60 = vmax.f32 %v4434_v5, 0.0 }
 0x57d   :  { %v4439_v24 = vpack.c.bf16 %v4438_v60, %v4437_v23 }
 0x57f   :  { %5253 = vmatmul.mubr.bf16.vlgmr.msra.gmra.mrb[136].mxu1 %v4439_v24 }
 0x652   :  { %v4545_v59 = vpop.f32.mrb[136].mxu1 }
 0x653   :  { %v4546_v46 = vadd.f32 %v5174_v44, %v4545_v59  ;;  %v5254_v16 = vpop.f32.mrb[137].mxu1 }
 0x654   :  { %v4548_v15 = vpop.f32.mrb[138].mxu1 }
 0x655   :  { %v4552_v8 = vmax.f32 %v4546_v46, 0.0  ;;  %v4549_v27 = vadd.f32 %v5174_v44, %v4548_v15  ;;  %v5255_v47 = vpop.f32.mrb[139].mxu1 }
 0x657   :  { %v4553_v28 = vmax.f32 %v4549_v27, 0.0  ;;  %v4557_v20 = vsel %vm4556_vm3, %v4552_v8, -1e+30 }
 0x658   :  { %4559 = vmax.xlane.f32.xlu0 %v4557_v20 }
 0x659   :  { %v4558_v29 = vsel %vm4556_vm3, %v4553_v28, -1e+30 }
 0x65c   :  { %4561 = vmax.xlane.f32.xlu0 %v4558_v29 }
 0x6e5   :  { %v4560_v48 = vpop.xlane.xlu0 %4559 }
 0x6e6   :  { %v4563_v49 = vsub.f32 %v4557_v20, %v4560_v48 }
 0x6e8   :  { %v4565_v9 = vmul.f32 1.442695, %v4563_v49 }
 0x6e9   :  { %v4562_v35 = vpop.xlane.xlu0 %4561 }
 0x6ea   :  { %v4564_v1 = vsub.f32 %v4558_v29, %v4562_v35  ;;  %6021 = vpow2.f32 %v4565_v9 }
 0x6ec   :  { %v4567_v42 = vmul.f32 1.442695, %v4564_v1 }
 0x6ee   :  { %6023 = vpow2.f32 %v4567_v42 }
 0x6f4   :  { %v6022_v31 = vpop.eup %6021 }
 0x6f5   :  { %4569 = vadd.xlane.f32.xlu1 %v6022_v31 }
 0x6f8   :  { %v6024_v61 = vpop.eup %6023 }
 0x6f9   :  { %4571 = vadd.xlane.f32.xlu1 %v6024_v61 }
 0x782   :  { %v4570_v55 = vpop.xlane.xlu1 %4569 }
 0x783   :  { %6025 = vlog2.f32 %v4570_v55 }
 0x786   :  { %v4572_v32 = vpop.xlane.xlu1 %4571 }
 0x787   :  { %6027 = vlog2.f32 %v4572_v32 }
 0x78d   :  { %v6026_v13 = vpop.eup %6025 }
 0x78e   :  { %v4574_v34 = vmul.f32 0.6931472, %v6026_v13 }
 0x790   :  { %v4577_v11 = vadd.f32 %v4574_v34, %v4560_v48 }
 0x791   :  { %v6028_v36 = vpop.eup %6027 }
 0x792   :  { %v4579_v7 = vsub.f32 %v4557_v20, %v4577_v11  ;;  %v4576_v2 = vmul.f32 0.6931472, %v6028_v36 }
 0x794   :  { %4581 = vst [vmem:[%s7537_s9] sm:$0xff] %v4579_v7  ;;  %v4578_v62 = vadd.f32 %v4576_v2, %v4562_v35 }
 0x796   :  { %v4580_v51 = vsub.f32 %v4558_v29, %v4578_v62 }
 0x798   :  { %4582 = vst [vmem:[%s7537_s9 + $0x8] sm:$0xff] %v4580_v51 }

</bundles_post_ra>
